<compile_context>
chip_gen: v6e
topology: v6e:2x2x1
jax: 0.10.0
libtpu: 0.0.40
codegen_flags: <defaults>
</compile_context>

<pallas_src>
import math

import jax
import jax.numpy as jnp
from jax import lax
from jax.experimental import pallas as pl
from jax.experimental.pallas import tpu as pltpu

# ---------------- model hyper-parameters (small, synthetic) ----------------
B = 2            # batch
S = 8            # sequence length
D = 32           # d_model
H = 4            # attention heads
DK = D // H      # per-head dim
DFF = 64         # feed-forward hidden dim
N_LAYERS = 2     # Encoder(layer, N) depth
EPS = 1e-6
SCALE = 1.0 / math.sqrt(DK)

assert H * DK == D, "attention heads must tile d_model exactly"


# ---------------- in-kernel helpers ----------------
def _layer_norm(x, gamma, beta):
    """Torch-style LayerNorm: unbiased std, a*(x-mean)/(std+eps)+b (exact recip)."""
    mean = jnp.mean(x, axis=-1, keepdims=True)
    var = jnp.sum((x - mean) ** 2, axis=-1, keepdims=True) / (x.shape[-1] - 1)
    inv = pl.reciprocal(jnp.sqrt(var) + EPS, approx=False)   # exact: LN feeds everything
    return gamma * (x - mean) * inv + beta


# ---------------- the fused Pallas kernel: one batch element per program ----------------
def encoder_kernel(x_ref,
                   wqkv_ref, bqkv_ref, wo_ref, bo_ref, ga_ref, ba_ref,
                   w1_ref, b1_ref, w2_ref, b2_ref, gf_ref, bf_ref,
                   gn_ref, bn_ref,
                   out_ref):
    x = x_ref[...]                          # (S, D) f32, VMEM-resident throughout

    for l in range(N_LAYERS):               # static unroll, N_LAYERS is small
        # ----- sublayer 1: pre-norm multi-head self-attention + residual -----
        y = _layer_norm(x, ga_ref[l], ba_ref[l])
        # fused q|k|v projection: one bf16 MXU matmul with 3*D output lanes.
        # (attention scale already folded into the Q columns on the host)
        qkv = jnp.dot(y.astype(jnp.bfloat16), wqkv_ref[l],
                      preferred_element_type=jnp.float32) + bqkv_ref[l]
        attn = jnp.zeros((S, D), jnp.float32)
        for h in range(H):                   # static unroll over heads
            qs = qkv[:, h * DK:(h + 1) * DK]
            ks = qkv[:, D + h * DK:D + (h + 1) * DK]
            vs = qkv[:, 2 * D + h * DK:2 * D + (h + 1) * DK]
            # q @ k^T: contract last dims of both operands (no explicit transpose)
            sc = lax.dot_general(qs, ks, (((1,), (1,)), ((), ())),
                                 preferred_element_type=jnp.float32)
            m = jnp.max(sc, axis=-1, keepdims=True)
            e = jnp.exp(sc - m)
            p = e * pl.reciprocal(jnp.sum(e, axis=-1, keepdims=True), approx=True)
            ctx_h = jnp.dot(p, vs, preferred_element_type=jnp.float32)   # (S, DK)
            # per-head output-projection accumulate: full-width register add,
            # no narrow masked stores, no VMEM context scratch.
            attn = attn + jnp.dot(ctx_h.astype(jnp.bfloat16), wo_ref[l, h],
                                  preferred_element_type=jnp.float32)
        x = x + attn + bo_ref[l]             # dropout = identity (eval)

        # ----- sublayer 2: pre-norm position-wise feed-forward + residual -----
        y = _layer_norm(x, gf_ref[l], bf_ref[l])
        hdn = jnp.maximum(
            jnp.dot(y.astype(jnp.bfloat16), w1_ref[l],
                    preferred_element_type=jnp.float32) + b1_ref[l], 0.0)
        x = x + jnp.dot(hdn.astype(jnp.bfloat16), w2_ref[l],
                        preferred_element_type=jnp.float32) + b2_ref[l]

    # final LayerNorm of the Encoder stack
    out_ref[...] = _layer_norm(x, gn_ref[...], bn_ref[...])


# ---------------- wrapper ----------------
def encoder_forward(x, params):
    """x: (B, S, D) f32 -> (B, S, D) f32."""
    bf16 = jnp.bfloat16

    # fold the 1/sqrt(DK) attention scale into the Q block of the fused QKV proj
    wqkv = (params["wqkv"].at[:, :, :D].multiply(SCALE)).astype(bf16)
    bqkv = params["bqkv"].at[:, :, :D].multiply(SCALE)
    # pre-split the output projection per head: (L, D, D) -> (L, H, DK, D) so the
    # kernel selects per-head weights by leading-dim index, never a sublane slice.
    wo = params["wo"].reshape(N_LAYERS, H, DK, D).astype(bf16)

    ins = (x,
           wqkv, bqkv, wo, params["bo"],
           params["ga"], params["ba"],
           params["w1"].astype(bf16), params["b1"],
           params["w2"].astype(bf16), params["b2"],
           params["gf"], params["bf"],
           params["gn"], params["bn"])

    def full_spec(a):
        nd = a.ndim
        return pl.BlockSpec(a.shape, lambda b, _nd=nd: (0,) * _nd)

    in_specs = ([pl.BlockSpec((None, S, D), lambda b: (b, 0, 0))]   # one batch element
                + [full_spec(a) for a in ins[1:]])                  # weights resident

    out = pl.pallas_call(
        encoder_kernel,
        out_shape=jax.ShapeDtypeStruct((B, S, D), jnp.float32),
        grid=(B,),
        in_specs=in_specs,
        out_specs=pl.BlockSpec((None, S, D), lambda b: (b, 0, 0)),
        compiler_params=pltpu.CompilerParams(
            dimension_semantics=("parallel",)),     # both TCs on v7x
    )(*ins)
    return out


# ---------------- pure-JAX f32 reference (sanity check) ----------------
def ref_encoder(x, params):
    def ln(t, g, b):
        mean = jnp.mean(t, axis=-1, keepdims=True)
        var = jnp.sum((t - mean) ** 2, axis=-1, keepdims=True) / (t.shape[-1] - 1)
        return g * (t - mean) / (jnp.sqrt(var) + EPS) + b

    def mha(q, k, v):
        qh = q.reshape(B, S, H, DK).transpose(0, 2, 1, 3)
        kh = k.reshape(B, S, H, DK).transpose(0, 2, 1, 3)
        vh = v.reshape(B, S, H, DK).transpose(0, 2, 1, 3)
        sc = jnp.einsum("bhqd,bhkd->bhqk", qh, kh) / math.sqrt(DK)
        p = jax.nn.softmax(sc, axis=-1)
        ctx = jnp.einsum("bhqk,bhkd->bhqd", p, vh)
        return ctx.transpose(0, 2, 1, 3).reshape(B, S, D)

    for l in range(N_LAYERS):
        y = ln(x, params["ga"][l], params["ba"][l])
        qkv = y @ params["wqkv"][l] + params["bqkv"][l]
        q, k, v = qkv[..., :D], qkv[..., D:2 * D], qkv[..., 2 * D:]
        x = x + (mha(q, k, v) @ params["wo"][l] + params["bo"][l])
        y = ln(x, params["gf"][l], params["bf"][l])
        hdn = jnp.maximum(y @ params["w1"][l] + params["b1"][l], 0.0)
        x = x + (hdn @ params["w2"][l] + params["b2"][l])
    return ln(x, params["gn"], params["bn"])


# ---------------- deterministic parameter init (torch Linear-style) ----------------
def make_params(key):
    def lin(k, din, dout):
        kw, kb = jax.random.split(k)
        lim = 1.0 / math.sqrt(din)
        w = jax.random.uniform(kw, (din, dout), jnp.float32, -lim, lim)
        b = jax.random.uniform(kb, (1, dout), jnp.float32, -lim, lim)
        return w, b

    keys = jax.random.split(key, N_LAYERS * 6)
    wqkv, bqkv, wo, bo, w1, b1, w2, b2 = ([] for _ in range(8))
    for l in range(N_LAYERS):
        kq, kk, kv, ko, k1, k2 = keys[l * 6:(l + 1) * 6]
        wq_, bq_ = lin(kq, D, D)
        wk_, bk_ = lin(kk, D, D)
        wv_, bv_ = lin(kv, D, D)
        wqkv.append(jnp.concatenate([wq_, wk_, wv_], axis=1))   # fused (D, 3D)
        bqkv.append(jnp.concatenate([bq_, bk_, bv_], axis=1))   # fused (1, 3D)
        w_, b_ = lin(ko, D, D);   wo.append(w_); bo.append(b_)
        w_, b_ = lin(k1, D, DFF); w1.append(w_); b1.append(b_)
        w_, b_ = lin(k2, DFF, D); w2.append(w_); b2.append(b_)

    st = lambda xs: jnp.stack(xs, axis=0)            # stack across layers
    ones = lambda: jnp.ones((N_LAYERS, 1, D), jnp.float32)
    zeros = lambda: jnp.zeros((N_LAYERS, 1, D), jnp.float32)
    return dict(
        wqkv=st(wqkv), bqkv=st(bqkv), wo=st(wo), bo=st(bo),
        w1=st(w1), b1=st(b1), w2=st(w2), b2=st(b2),
        ga=ones(), ba=zeros(),                       # LN before self-attention
        gf=ones(), bf=zeros(),                       # LN before feed-forward
        gn=jnp.ones((1, D), jnp.float32),            # final Encoder LayerNorm
        bn=jnp.zeros((1, D), jnp.float32),
    )


if __name__ == "__main__":
    key = jax.random.PRNGKey(0)
    kx, kp = jax.random.split(key)
    x = jax.random.normal(kx, (B, S, D), jnp.float32)
    params = make_params(kp)

    fwd = jax.jit(encoder_forward)
    out = fwd(x, params)
    jax.block_until_ready(out)

    ref = ref_encoder(x, params)
    assert out.shape == (B, S, D)
    max_err = float(jnp.max(jnp.abs(out - ref)))
    # loose tolerance: projection matmuls run with bf16 operands (f32 accumulate)
    assert jnp.allclose(out, ref, rtol=5e-2, atol=5e-2), (
        f"mismatch vs JAX reference: max|err|={max_err}")
    print("KERNEL_OK")
</pallas_src>

<mosaic_0001>
module attributes {stable_mosaic.version = 11 : i64} {
  func.func @encoder_kernel(%arg0: i32, %arg1: memref<1x8x32xf32, #tpu.memory_space<vmem>>, %arg2: memref<2x32x96xbf16, #tpu.memory_space<vmem>>, %arg3: memref<2x1x96xf32, #tpu.memory_space<vmem>>, %arg4: memref<2x4x8x32xbf16, #tpu.memory_space<vmem>>, %arg5: memref<2x1x32xf32, #tpu.memory_space<vmem>>, %arg6: memref<2x1x32xf32, #tpu.memory_space<vmem>>, %arg7: memref<2x1x32xf32, #tpu.memory_space<vmem>>, %arg8: memref<2x32x64xbf16, #tpu.memory_space<vmem>>, %arg9: memref<2x1x64xf32, #tpu.memory_space<vmem>>, %arg10: memref<2x64x32xbf16, #tpu.memory_space<vmem>>, %arg11: memref<2x1x32xf32, #tpu.memory_space<vmem>>, %arg12: memref<2x1x32xf32, #tpu.memory_space<vmem>>, %arg13: memref<2x1x32xf32, #tpu.memory_space<vmem>>, %arg14: memref<1x32xf32, #tpu.memory_space<vmem>>, %arg15: memref<1x32xf32, #tpu.memory_space<vmem>>, %arg16: memref<1x8x32xf32, #tpu.memory_space<vmem>>) attributes {dimension_semantics = [#tpu.dimension_semantics<parallel>], iteration_bounds = array<i64: 2>, scalar_prefetch = 0 : i64, scratch_operands = 0 : i64, tpu.core_type = #tpu.core_type<tc>, window_params = [{transform_indices = @transform_0, window_bounds = array<i64: 1, 8, 32>}, {pipeline_mode = #tpu.pipeline_mode<synchronous>, transform_indices = @transform_1, window_bounds = array<i64: 2, 32, 96>}, {pipeline_mode = #tpu.pipeline_mode<synchronous>, transform_indices = @transform_2, window_bounds = array<i64: 2, 1, 96>}, {pipeline_mode = #tpu.pipeline_mode<synchronous>, transform_indices = @transform_3, window_bounds = array<i64: 2, 4, 8, 32>}, {pipeline_mode = #tpu.pipeline_mode<synchronous>, transform_indices = @transform_4, window_bounds = array<i64: 2, 1, 32>}, {pipeline_mode = #tpu.pipeline_mode<synchronous>, transform_indices = @transform_5, window_bounds = array<i64: 2, 1, 32>}, {pipeline_mode = #tpu.pipeline_mode<synchronous>, transform_indices = @transform_6, window_bounds = array<i64: 2, 1, 32>}, {pipeline_mode = #tpu.pipeline_mode<synchronous>, transform_indices = @transform_7, window_bounds = array<i64: 2, 32, 64>}, {pipeline_mode = #tpu.pipeline_mode<synchronous>, transform_indices = @transform_8, window_bounds = array<i64: 2, 1, 64>}, {pipeline_mode = #tpu.pipeline_mode<synchronous>, transform_indices = @transform_9, window_bounds = array<i64: 2, 64, 32>}, {pipeline_mode = #tpu.pipeline_mode<synchronous>, transform_indices = @transform_10, window_bounds = array<i64: 2, 1, 32>}, {pipeline_mode = #tpu.pipeline_mode<synchronous>, transform_indices = @transform_11, window_bounds = array<i64: 2, 1, 32>}, {pipeline_mode = #tpu.pipeline_mode<synchronous>, transform_indices = @transform_12, window_bounds = array<i64: 2, 1, 32>}, {pipeline_mode = #tpu.pipeline_mode<synchronous>, transform_indices = @transform_13, window_bounds = array<i64: 1, 32>}, {pipeline_mode = #tpu.pipeline_mode<synchronous>, transform_indices = @transform_14, window_bounds = array<i64: 1, 32>}, {transform_indices = @transform_15, window_bounds = array<i64: 1, 8, 32>}]} {
    %c0 = arith.constant 0 : index
    %c0_0 = arith.constant 0 : index
    %c0_1 = arith.constant 0 : index
    %0 = vector.load %arg1[%c0, %c0_0, %c0_1] : memref<1x8x32xf32, #tpu.memory_space<vmem>>, vector<1x8x32xf32>
    %1 = vector.shape_cast %0 : vector<1x8x32xf32> to vector<8x32xf32>
    %c0_2 = arith.constant 0 : index
    %c0_3 = arith.constant 0 : index
    %c0_4 = arith.constant 0 : index
    %2 = vector.load %arg6[%c0_2, %c0_3, %c0_4] : memref<2x1x32xf32, #tpu.memory_space<vmem>>, vector<1x1x32xf32>
    %3 = vector.shape_cast %2 : vector<1x1x32xf32> to vector<1x32xf32>
    %c0_5 = arith.constant 0 : index
    %c0_6 = arith.constant 0 : index
    %c0_7 = arith.constant 0 : index
    %4 = vector.load %arg7[%c0_5, %c0_6, %c0_7] : memref<2x1x32xf32, #tpu.memory_space<vmem>>, vector<1x1x32xf32>
    %5 = vector.shape_cast %4 : vector<1x1x32xf32> to vector<1x32xf32>
    %cst = arith.constant dense<0.000000e+00> : vector<8xf32>
    %6 = vector.multi_reduction <add>, %1, %cst [1] : vector<8x32xf32> to vector<8xf32>
    %7 = vector.shape_cast %6 : vector<8xf32> to vector<8x1xf32>
    %cst_8 = arith.constant 3.200000e+01 : f32
    %8 = vector.broadcast %cst_8 : f32 to vector<8x1xf32>
    %9 = arith.divf %7, %8 : vector<8x1xf32>
    %10 = vector.broadcast %9 : vector<8x1xf32> to vector<8x32xf32>
    %11 = arith.subf %1, %10 : vector<8x32xf32>
    %12 = arith.mulf %11, %11 : vector<8x32xf32>
    %cst_9 = arith.constant dense<0.000000e+00> : vector<8xf32>
    %13 = vector.multi_reduction <add>, %12, %cst_9 [1] : vector<8x32xf32> to vector<8xf32>
    %14 = vector.shape_cast %13 : vector<8xf32> to vector<8x1xf32>
    %cst_10 = arith.constant 3.100000e+01 : f32
    %15 = vector.broadcast %cst_10 : f32 to vector<8x1xf32>
    %16 = arith.divf %14, %15 : vector<8x1xf32>
    %17 = math.sqrt %16 : vector<8x1xf32>
    %cst_11 = arith.constant 9.99999997E-7 : f32
    %18 = vector.broadcast %cst_11 : f32 to vector<8x1xf32>
    %19 = arith.addf %17, %18 : vector<8x1xf32>
    %20 = tpu.reciprocal %19 : vector<8x1xf32> -> vector<8x1xf32>
    %21 = vector.broadcast %9 : vector<8x1xf32> to vector<8x32xf32>
    %22 = arith.subf %1, %21 : vector<8x32xf32>
    %23 = vector.broadcast %3 : vector<1x32xf32> to vector<8x32xf32>
    %24 = arith.mulf %23, %22 : vector<8x32xf32>
    %25 = vector.broadcast %20 : vector<8x1xf32> to vector<8x32xf32>
    %26 = arith.mulf %24, %25 : vector<8x32xf32>
    %27 = vector.broadcast %5 : vector<1x32xf32> to vector<8x32xf32>
    %28 = arith.addf %26, %27 : vector<8x32xf32>
    %29 = arith.truncf %28 : vector<8x32xf32> to vector<8x32xbf16>
    %c0_12 = arith.constant 0 : index
    %c0_13 = arith.constant 0 : index
    %c0_14 = arith.constant 0 : index
    %30 = vector.load %arg2[%c0_12, %c0_13, %c0_14] : memref<2x32x96xbf16, #tpu.memory_space<vmem>>, vector<1x32x96xbf16>
    %31 = vector.shape_cast %30 : vector<1x32x96xbf16> to vector<32x96xbf16>
    %cst_15 = arith.constant dense<0.000000e+00> : vector<8x96xf32>
    %32 = tpu.matmul %29, %31, %cst_15 {dimension_numbers = #tpu.dot_dimension_numbers<[1], [0], [0], [1], [0, 0, 1, 1], [], []>} : vector<8x32xbf16>, vector<32x96xbf16>, vector<8x96xf32> -> vector<8x96xf32>
    %c0_16 = arith.constant 0 : index
    %c0_17 = arith.constant 0 : index
    %c0_18 = arith.constant 0 : index
    %33 = vector.load %arg3[%c0_16, %c0_17, %c0_18] : memref<2x1x96xf32, #tpu.memory_space<vmem>>, vector<1x1x96xf32>
    %34 = vector.shape_cast %33 : vector<1x1x96xf32> to vector<1x96xf32>
    %35 = vector.broadcast %34 : vector<1x96xf32> to vector<8x96xf32>
    %36 = arith.addf %32, %35 : vector<8x96xf32>
    %cst_19 = arith.constant 0.000000e+00 : f32
    %37 = vector.broadcast %cst_19 : f32 to vector<8x32xf32>
    %38 = vector.extract_strided_slice %36 {offsets = [0, 0], sizes = [8, 8], strides = [1, 1]} : vector<8x96xf32> to vector<8x8xf32>
    %39 = vector.extract_strided_slice %36 {offsets = [0, 32], sizes = [8, 8], strides = [1, 1]} : vector<8x96xf32> to vector<8x8xf32>
    %40 = vector.extract_strided_slice %36 {offsets = [0, 64], sizes = [8, 8], strides = [1, 1]} : vector<8x96xf32> to vector<8x8xf32>
    %cst_20 = arith.constant dense<0.000000e+00> : vector<8x8xf32>
    %41 = tpu.matmul %38, %39, %cst_20 {dimension_numbers = #tpu.dot_dimension_numbers<[1], [1], [0], [0], [0, 0, 1, 0], [], []>} : vector<8x8xf32>, vector<8x8xf32>, vector<8x8xf32> -> vector<8x8xf32>
    %cst_21 = arith.constant dense<0xFF800000> : vector<8xf32>
    %42 = vector.multi_reduction <maximumf>, %41, %cst_21 [1] : vector<8x8xf32> to vector<8xf32>
    %43 = vector.shape_cast %42 : vector<8xf32> to vector<8x1xf32>
    %44 = vector.broadcast %43 : vector<8x1xf32> to vector<8x8xf32>
    %45 = arith.subf %41, %44 : vector<8x8xf32>
    %46 = math.exp %45 : vector<8x8xf32>
    %cst_22 = arith.constant dense<0.000000e+00> : vector<8xf32>
    %47 = vector.multi_reduction <add>, %46, %cst_22 [1] : vector<8x8xf32> to vector<8xf32>
    %48 = vector.shape_cast %47 : vector<8xf32> to vector<8x1xf32>
    %49 = tpu.reciprocal %48 {approx = true} : vector<8x1xf32> -> vector<8x1xf32>
    %50 = vector.broadcast %49 : vector<8x1xf32> to vector<8x8xf32>
    %51 = arith.mulf %46, %50 : vector<8x8xf32>
    %cst_23 = arith.constant dense<0.000000e+00> : vector<8x8xf32>
    %52 = tpu.matmul %51, %40, %cst_23 {dimension_numbers = #tpu.dot_dimension_numbers<[1], [0], [0], [1], [0, 0, 1, 1], [], []>} : vector<8x8xf32>, vector<8x8xf32>, vector<8x8xf32> -> vector<8x8xf32>
    %53 = arith.truncf %52 : vector<8x8xf32> to vector<8x8xbf16>
    %c0_24 = arith.constant 0 : index
    %c0_25 = arith.constant 0 : index
    %c0_26 = arith.constant 0 : index
    %c0_27 = arith.constant 0 : index
    %54 = vector.load %arg4[%c0_24, %c0_25, %c0_26, %c0_27] : memref<2x4x8x32xbf16, #tpu.memory_space<vmem>>, vector<1x1x8x32xbf16>
    %55 = vector.shape_cast %54 : vector<1x1x8x32xbf16> to vector<8x32xbf16>
    %cst_28 = arith.constant dense<0.000000e+00> : vector<8x32xf32>
    %56 = tpu.matmul %53, %55, %cst_28 {dimension_numbers = #tpu.dot_dimension_numbers<[1], [0], [0], [1], [0, 0, 1, 1], [], []>} : vector<8x8xbf16>, vector<8x32xbf16>, vector<8x32xf32> -> vector<8x32xf32>
    %57 = arith.addf %37, %56 : vector<8x32xf32>
    %58 = vector.extract_strided_slice %36 {offsets = [0, 8], sizes = [8, 8], strides = [1, 1]} : vector<8x96xf32> to vector<8x8xf32>
    %59 = vector.extract_strided_slice %36 {offsets = [0, 40], sizes = [8, 8], strides = [1, 1]} : vector<8x96xf32> to vector<8x8xf32>
    %60 = vector.extract_strided_slice %36 {offsets = [0, 72], sizes = [8, 8], strides = [1, 1]} : vector<8x96xf32> to vector<8x8xf32>
    %cst_29 = arith.constant dense<0.000000e+00> : vector<8x8xf32>
    %61 = tpu.matmul %58, %59, %cst_29 {dimension_numbers = #tpu.dot_dimension_numbers<[1], [1], [0], [0], [0, 0, 1, 0], [], []>} : vector<8x8xf32>, vector<8x8xf32>, vector<8x8xf32> -> vector<8x8xf32>
    %cst_30 = arith.constant dense<0xFF800000> : vector<8xf32>
    %62 = vector.multi_reduction <maximumf>, %61, %cst_30 [1] : vector<8x8xf32> to vector<8xf32>
    %63 = vector.shape_cast %62 : vector<8xf32> to vector<8x1xf32>
    %64 = vector.broadcast %63 : vector<8x1xf32> to vector<8x8xf32>
    %65 = arith.subf %61, %64 : vector<8x8xf32>
    %66 = math.exp %65 : vector<8x8xf32>
    %cst_31 = arith.constant dense<0.000000e+00> : vector<8xf32>
    %67 = vector.multi_reduction <add>, %66, %cst_31 [1] : vector<8x8xf32> to vector<8xf32>
    %68 = vector.shape_cast %67 : vector<8xf32> to vector<8x1xf32>
    %69 = tpu.reciprocal %68 {approx = true} : vector<8x1xf32> -> vector<8x1xf32>
    %70 = vector.broadcast %69 : vector<8x1xf32> to vector<8x8xf32>
    %71 = arith.mulf %66, %70 : vector<8x8xf32>
    %cst_32 = arith.constant dense<0.000000e+00> : vector<8x8xf32>
    %72 = tpu.matmul %71, %60, %cst_32 {dimension_numbers = #tpu.dot_dimension_numbers<[1], [0], [0], [1], [0, 0, 1, 1], [], []>} : vector<8x8xf32>, vector<8x8xf32>, vector<8x8xf32> -> vector<8x8xf32>
    %73 = arith.truncf %72 : vector<8x8xf32> to vector<8x8xbf16>
    %c0_33 = arith.constant 0 : index
    %c1 = arith.constant 1 : index
    %c0_34 = arith.constant 0 : index
    %c0_35 = arith.constant 0 : index
    %74 = vector.load %arg4[%c0_33, %c1, %c0_34, %c0_35] : memref<2x4x8x32xbf16, #tpu.memory_space<vmem>>, vector<1x1x8x32xbf16>
    %75 = vector.shape_cast %74 : vector<1x1x8x32xbf16> to vector<8x32xbf16>
    %cst_36 = arith.constant dense<0.000000e+00> : vector<8x32xf32>
    %76 = tpu.matmul %73, %75, %cst_36 {dimension_numbers = #tpu.dot_dimension_numbers<[1], [0], [0], [1], [0, 0, 1, 1], [], []>} : vector<8x8xbf16>, vector<8x32xbf16>, vector<8x32xf32> -> vector<8x32xf32>
    %77 = arith.addf %57, %76 : vector<8x32xf32>
    %78 = vector.extract_strided_slice %36 {offsets = [0, 16], sizes = [8, 8], strides = [1, 1]} : vector<8x96xf32> to vector<8x8xf32>
    %79 = vector.extract_strided_slice %36 {offsets = [0, 48], sizes = [8, 8], strides = [1, 1]} : vector<8x96xf32> to vector<8x8xf32>
    %80 = vector.extract_strided_slice %36 {offsets = [0, 80], sizes = [8, 8], strides = [1, 1]} : vector<8x96xf32> to vector<8x8xf32>
    %cst_37 = arith.constant dense<0.000000e+00> : vector<8x8xf32>
    %81 = tpu.matmul %78, %79, %cst_37 {dimension_numbers = #tpu.dot_dimension_numbers<[1], [1], [0], [0], [0, 0, 1, 0], [], []>} : vector<8x8xf32>, vector<8x8xf32>, vector<8x8xf32> -> vector<8x8xf32>
    %cst_38 = arith.constant dense<0xFF800000> : vector<8xf32>
    %82 = vector.multi_reduction <maximumf>, %81, %cst_38 [1] : vector<8x8xf32> to vector<8xf32>
    %83 = vector.shape_cast %82 : vector<8xf32> to vector<8x1xf32>
    %84 = vector.broadcast %83 : vector<8x1xf32> to vector<8x8xf32>
    %85 = arith.subf %81, %84 : vector<8x8xf32>
    %86 = math.exp %85 : vector<8x8xf32>
    %cst_39 = arith.constant dense<0.000000e+00> : vector<8xf32>
    %87 = vector.multi_reduction <add>, %86, %cst_39 [1] : vector<8x8xf32> to vector<8xf32>
    %88 = vector.shape_cast %87 : vector<8xf32> to vector<8x1xf32>
    %89 = tpu.reciprocal %88 {approx = true} : vector<8x1xf32> -> vector<8x1xf32>
    %90 = vector.broadcast %89 : vector<8x1xf32> to vector<8x8xf32>
    %91 = arith.mulf %86, %90 : vector<8x8xf32>
    %cst_40 = arith.constant dense<0.000000e+00> : vector<8x8xf32>
    %92 = tpu.matmul %91, %80, %cst_40 {dimension_numbers = #tpu.dot_dimension_numbers<[1], [0], [0], [1], [0, 0, 1, 1], [], []>} : vector<8x8xf32>, vector<8x8xf32>, vector<8x8xf32> -> vector<8x8xf32>
    %93 = arith.truncf %92 : vector<8x8xf32> to vector<8x8xbf16>
    %c0_41 = arith.constant 0 : index
    %c2 = arith.constant 2 : index
    %c0_42 = arith.constant 0 : index
    %c0_43 = arith.constant 0 : index
    %94 = vector.load %arg4[%c0_41, %c2, %c0_42, %c0_43] : memref<2x4x8x32xbf16, #tpu.memory_space<vmem>>, vector<1x1x8x32xbf16>
    %95 = vector.shape_cast %94 : vector<1x1x8x32xbf16> to vector<8x32xbf16>
    %cst_44 = arith.constant dense<0.000000e+00> : vector<8x32xf32>
    %96 = tpu.matmul %93, %95, %cst_44 {dimension_numbers = #tpu.dot_dimension_numbers<[1], [0], [0], [1], [0, 0, 1, 1], [], []>} : vector<8x8xbf16>, vector<8x32xbf16>, vector<8x32xf32> -> vector<8x32xf32>
    %97 = arith.addf %77, %96 : vector<8x32xf32>
    %98 = vector.extract_strided_slice %36 {offsets = [0, 24], sizes = [8, 8], strides = [1, 1]} : vector<8x96xf32> to vector<8x8xf32>
    %99 = vector.extract_strided_slice %36 {offsets = [0, 56], sizes = [8, 8], strides = [1, 1]} : vector<8x96xf32> to vector<8x8xf32>
    %100 = vector.extract_strided_slice %36 {offsets = [0, 88], sizes = [8, 8], strides = [1, 1]} : vector<8x96xf32> to vector<8x8xf32>
    %cst_45 = arith.constant dense<0.000000e+00> : vector<8x8xf32>
    %101 = tpu.matmul %98, %99, %cst_45 {dimension_numbers = #tpu.dot_dimension_numbers<[1], [1], [0], [0], [0, 0, 1, 0], [], []>} : vector<8x8xf32>, vector<8x8xf32>, vector<8x8xf32> -> vector<8x8xf32>
    %cst_46 = arith.constant dense<0xFF800000> : vector<8xf32>
    %102 = vector.multi_reduction <maximumf>, %101, %cst_46 [1] : vector<8x8xf32> to vector<8xf32>
    %103 = vector.shape_cast %102 : vector<8xf32> to vector<8x1xf32>
    %104 = vector.broadcast %103 : vector<8x1xf32> to vector<8x8xf32>
    %105 = arith.subf %101, %104 : vector<8x8xf32>
    %106 = math.exp %105 : vector<8x8xf32>
    %cst_47 = arith.constant dense<0.000000e+00> : vector<8xf32>
    %107 = vector.multi_reduction <add>, %106, %cst_47 [1] : vector<8x8xf32> to vector<8xf32>
    %108 = vector.shape_cast %107 : vector<8xf32> to vector<8x1xf32>
    %109 = tpu.reciprocal %108 {approx = true} : vector<8x1xf32> -> vector<8x1xf32>
    %110 = vector.broadcast %109 : vector<8x1xf32> to vector<8x8xf32>
    %111 = arith.mulf %106, %110 : vector<8x8xf32>
    %cst_48 = arith.constant dense<0.000000e+00> : vector<8x8xf32>
    %112 = tpu.matmul %111, %100, %cst_48 {dimension_numbers = #tpu.dot_dimension_numbers<[1], [0], [0], [1], [0, 0, 1, 1], [], []>} : vector<8x8xf32>, vector<8x8xf32>, vector<8x8xf32> -> vector<8x8xf32>
    %113 = arith.truncf %112 : vector<8x8xf32> to vector<8x8xbf16>
    %c0_49 = arith.constant 0 : index
    %c3 = arith.constant 3 : index
    %c0_50 = arith.constant 0 : index
    %c0_51 = arith.constant 0 : index
    %114 = vector.load %arg4[%c0_49, %c3, %c0_50, %c0_51] : memref<2x4x8x32xbf16, #tpu.memory_space<vmem>>, vector<1x1x8x32xbf16>
    %115 = vector.shape_cast %114 : vector<1x1x8x32xbf16> to vector<8x32xbf16>
    %cst_52 = arith.constant dense<0.000000e+00> : vector<8x32xf32>
    %116 = tpu.matmul %113, %115, %cst_52 {dimension_numbers = #tpu.dot_dimension_numbers<[1], [0], [0], [1], [0, 0, 1, 1], [], []>} : vector<8x8xbf16>, vector<8x32xbf16>, vector<8x32xf32> -> vector<8x32xf32>
    %117 = arith.addf %97, %116 : vector<8x32xf32>
    %118 = arith.addf %1, %117 : vector<8x32xf32>
    %c0_53 = arith.constant 0 : index
    %c0_54 = arith.constant 0 : index
    %c0_55 = arith.constant 0 : index
    %119 = vector.load %arg5[%c0_53, %c0_54, %c0_55] : memref<2x1x32xf32, #tpu.memory_space<vmem>>, vector<1x1x32xf32>
    %120 = vector.shape_cast %119 : vector<1x1x32xf32> to vector<1x32xf32>
    %121 = vector.broadcast %120 : vector<1x32xf32> to vector<8x32xf32>
    %122 = arith.addf %118, %121 : vector<8x32xf32>
    %c0_56 = arith.constant 0 : index
    %c0_57 = arith.constant 0 : index
    %c0_58 = arith.constant 0 : index
    %123 = vector.load %arg12[%c0_56, %c0_57, %c0_58] : memref<2x1x32xf32, #tpu.memory_space<vmem>>, vector<1x1x32xf32>
    %124 = vector.shape_cast %123 : vector<1x1x32xf32> to vector<1x32xf32>
    %c0_59 = arith.constant 0 : index
    %c0_60 = arith.constant 0 : index
    %c0_61 = arith.constant 0 : index
    %125 = vector.load %arg13[%c0_59, %c0_60, %c0_61] : memref<2x1x32xf32, #tpu.memory_space<vmem>>, vector<1x1x32xf32>
    %126 = vector.shape_cast %125 : vector<1x1x32xf32> to vector<1x32xf32>
    %cst_62 = arith.constant dense<0.000000e+00> : vector<8xf32>
    %127 = vector.multi_reduction <add>, %122, %cst_62 [1] : vector<8x32xf32> to vector<8xf32>
    %128 = vector.shape_cast %127 : vector<8xf32> to vector<8x1xf32>
    %cst_63 = arith.constant 3.200000e+01 : f32
    %129 = vector.broadcast %cst_63 : f32 to vector<8x1xf32>
    %130 = arith.divf %128, %129 : vector<8x1xf32>
    %131 = vector.broadcast %130 : vector<8x1xf32> to vector<8x32xf32>
    %132 = arith.subf %122, %131 : vector<8x32xf32>
    %133 = arith.mulf %132, %132 : vector<8x32xf32>
    %cst_64 = arith.constant dense<0.000000e+00> : vector<8xf32>
    %134 = vector.multi_reduction <add>, %133, %cst_64 [1] : vector<8x32xf32> to vector<8xf32>
    %135 = vector.shape_cast %134 : vector<8xf32> to vector<8x1xf32>
    %cst_65 = arith.constant 3.100000e+01 : f32
    %136 = vector.broadcast %cst_65 : f32 to vector<8x1xf32>
    %137 = arith.divf %135, %136 : vector<8x1xf32>
    %138 = math.sqrt %137 : vector<8x1xf32>
    %cst_66 = arith.constant 9.99999997E-7 : f32
    %139 = vector.broadcast %cst_66 : f32 to vector<8x1xf32>
    %140 = arith.addf %138, %139 : vector<8x1xf32>
    %141 = tpu.reciprocal %140 : vector<8x1xf32> -> vector<8x1xf32>
    %142 = vector.broadcast %130 : vector<8x1xf32> to vector<8x32xf32>
    %143 = arith.subf %122, %142 : vector<8x32xf32>
    %144 = vector.broadcast %124 : vector<1x32xf32> to vector<8x32xf32>
    %145 = arith.mulf %144, %143 : vector<8x32xf32>
    %146 = vector.broadcast %141 : vector<8x1xf32> to vector<8x32xf32>
    %147 = arith.mulf %145, %146 : vector<8x32xf32>
    %148 = vector.broadcast %126 : vector<1x32xf32> to vector<8x32xf32>
    %149 = arith.addf %147, %148 : vector<8x32xf32>
    %150 = arith.truncf %149 : vector<8x32xf32> to vector<8x32xbf16>
    %c0_67 = arith.constant 0 : index
    %c0_68 = arith.constant 0 : index
    %c0_69 = arith.constant 0 : index
    %151 = vector.load %arg8[%c0_67, %c0_68, %c0_69] : memref<2x32x64xbf16, #tpu.memory_space<vmem>>, vector<1x32x64xbf16>
    %152 = vector.shape_cast %151 : vector<1x32x64xbf16> to vector<32x64xbf16>
    %cst_70 = arith.constant dense<0.000000e+00> : vector<8x64xf32>
    %153 = tpu.matmul %150, %152, %cst_70 {dimension_numbers = #tpu.dot_dimension_numbers<[1], [0], [0], [1], [0, 0, 1, 1], [], []>} : vector<8x32xbf16>, vector<32x64xbf16>, vector<8x64xf32> -> vector<8x64xf32>
    %c0_71 = arith.constant 0 : index
    %c0_72 = arith.constant 0 : index
    %c0_73 = arith.constant 0 : index
    %154 = vector.load %arg9[%c0_71, %c0_72, %c0_73] : memref<2x1x64xf32, #tpu.memory_space<vmem>>, vector<1x1x64xf32>
    %155 = vector.shape_cast %154 : vector<1x1x64xf32> to vector<1x64xf32>
    %156 = vector.broadcast %155 : vector<1x64xf32> to vector<8x64xf32>
    %157 = arith.addf %153, %156 : vector<8x64xf32>
    %cst_74 = arith.constant 0.000000e+00 : f32
    %158 = vector.broadcast %cst_74 : f32 to vector<8x64xf32>
    %159 = arith.maximumf %157, %158 : vector<8x64xf32>
    %160 = arith.truncf %159 : vector<8x64xf32> to vector<8x64xbf16>
    %c0_75 = arith.constant 0 : index
    %c0_76 = arith.constant 0 : index
    %c0_77 = arith.constant 0 : index
    %161 = vector.load %arg10[%c0_75, %c0_76, %c0_77] : memref<2x64x32xbf16, #tpu.memory_space<vmem>>, vector<1x64x32xbf16>
    %162 = vector.shape_cast %161 : vector<1x64x32xbf16> to vector<64x32xbf16>
    %cst_78 = arith.constant dense<0.000000e+00> : vector<8x32xf32>
    %163 = tpu.matmul %160, %162, %cst_78 {dimension_numbers = #tpu.dot_dimension_numbers<[1], [0], [0], [1], [0, 0, 1, 1], [], []>} : vector<8x64xbf16>, vector<64x32xbf16>, vector<8x32xf32> -> vector<8x32xf32>
    %164 = arith.addf %122, %163 : vector<8x32xf32>
    %c0_79 = arith.constant 0 : index
    %c0_80 = arith.constant 0 : index
    %c0_81 = arith.constant 0 : index
    %165 = vector.load %arg11[%c0_79, %c0_80, %c0_81] : memref<2x1x32xf32, #tpu.memory_space<vmem>>, vector<1x1x32xf32>
    %166 = vector.shape_cast %165 : vector<1x1x32xf32> to vector<1x32xf32>
    %167 = vector.broadcast %166 : vector<1x32xf32> to vector<8x32xf32>
    %168 = arith.addf %164, %167 : vector<8x32xf32>
    %c1_82 = arith.constant 1 : index
    %c0_83 = arith.constant 0 : index
    %c0_84 = arith.constant 0 : index
    %169 = vector.load %arg6[%c1_82, %c0_83, %c0_84] : memref<2x1x32xf32, #tpu.memory_space<vmem>>, vector<1x1x32xf32>
    %170 = vector.shape_cast %169 : vector<1x1x32xf32> to vector<1x32xf32>
    %c1_85 = arith.constant 1 : index
    %c0_86 = arith.constant 0 : index
    %c0_87 = arith.constant 0 : index
    %171 = vector.load %arg7[%c1_85, %c0_86, %c0_87] : memref<2x1x32xf32, #tpu.memory_space<vmem>>, vector<1x1x32xf32>
    %172 = vector.shape_cast %171 : vector<1x1x32xf32> to vector<1x32xf32>
    %cst_88 = arith.constant dense<0.000000e+00> : vector<8xf32>
    %173 = vector.multi_reduction <add>, %168, %cst_88 [1] : vector<8x32xf32> to vector<8xf32>
    %174 = vector.shape_cast %173 : vector<8xf32> to vector<8x1xf32>
    %cst_89 = arith.constant 3.200000e+01 : f32
    %175 = vector.broadcast %cst_89 : f32 to vector<8x1xf32>
    %176 = arith.divf %174, %175 : vector<8x1xf32>
    %177 = vector.broadcast %176 : vector<8x1xf32> to vector<8x32xf32>
    %178 = arith.subf %168, %177 : vector<8x32xf32>
    %179 = arith.mulf %178, %178 : vector<8x32xf32>
    %cst_90 = arith.constant dense<0.000000e+00> : vector<8xf32>
    %180 = vector.multi_reduction <add>, %179, %cst_90 [1] : vector<8x32xf32> to vector<8xf32>
    %181 = vector.shape_cast %180 : vector<8xf32> to vector<8x1xf32>
    %cst_91 = arith.constant 3.100000e+01 : f32
    %182 = vector.broadcast %cst_91 : f32 to vector<8x1xf32>
    %183 = arith.divf %181, %182 : vector<8x1xf32>
    %184 = math.sqrt %183 : vector<8x1xf32>
    %cst_92 = arith.constant 9.99999997E-7 : f32
    %185 = vector.broadcast %cst_92 : f32 to vector<8x1xf32>
    %186 = arith.addf %184, %185 : vector<8x1xf32>
    %187 = tpu.reciprocal %186 : vector<8x1xf32> -> vector<8x1xf32>
    %188 = vector.broadcast %176 : vector<8x1xf32> to vector<8x32xf32>
    %189 = arith.subf %168, %188 : vector<8x32xf32>
    %190 = vector.broadcast %170 : vector<1x32xf32> to vector<8x32xf32>
    %191 = arith.mulf %190, %189 : vector<8x32xf32>
    %192 = vector.broadcast %187 : vector<8x1xf32> to vector<8x32xf32>
    %193 = arith.mulf %191, %192 : vector<8x32xf32>
    %194 = vector.broadcast %172 : vector<1x32xf32> to vector<8x32xf32>
    %195 = arith.addf %193, %194 : vector<8x32xf32>
    %196 = arith.truncf %195 : vector<8x32xf32> to vector<8x32xbf16>
    %c1_93 = arith.constant 1 : index
    %c0_94 = arith.constant 0 : index
    %c0_95 = arith.constant 0 : index
    %197 = vector.load %arg2[%c1_93, %c0_94, %c0_95] : memref<2x32x96xbf16, #tpu.memory_space<vmem>>, vector<1x32x96xbf16>
    %198 = vector.shape_cast %197 : vector<1x32x96xbf16> to vector<32x96xbf16>
    %cst_96 = arith.constant dense<0.000000e+00> : vector<8x96xf32>
    %199 = tpu.matmul %196, %198, %cst_96 {dimension_numbers = #tpu.dot_dimension_numbers<[1], [0], [0], [1], [0, 0, 1, 1], [], []>} : vector<8x32xbf16>, vector<32x96xbf16>, vector<8x96xf32> -> vector<8x96xf32>
    %c1_97 = arith.constant 1 : index
    %c0_98 = arith.constant 0 : index
    %c0_99 = arith.constant 0 : index
    %200 = vector.load %arg3[%c1_97, %c0_98, %c0_99] : memref<2x1x96xf32, #tpu.memory_space<vmem>>, vector<1x1x96xf32>
    %201 = vector.shape_cast %200 : vector<1x1x96xf32> to vector<1x96xf32>
    %202 = vector.broadcast %201 : vector<1x96xf32> to vector<8x96xf32>
    %203 = arith.addf %199, %202 : vector<8x96xf32>
    %cst_100 = arith.constant 0.000000e+00 : f32
    %204 = vector.broadcast %cst_100 : f32 to vector<8x32xf32>
    %205 = vector.extract_strided_slice %203 {offsets = [0, 0], sizes = [8, 8], strides = [1, 1]} : vector<8x96xf32> to vector<8x8xf32>
    %206 = vector.extract_strided_slice %203 {offsets = [0, 32], sizes = [8, 8], strides = [1, 1]} : vector<8x96xf32> to vector<8x8xf32>
    %207 = vector.extract_strided_slice %203 {offsets = [0, 64], sizes = [8, 8], strides = [1, 1]} : vector<8x96xf32> to vector<8x8xf32>
    %cst_101 = arith.constant dense<0.000000e+00> : vector<8x8xf32>
    %208 = tpu.matmul %205, %206, %cst_101 {dimension_numbers = #tpu.dot_dimension_numbers<[1], [1], [0], [0], [0, 0, 1, 0], [], []>} : vector<8x8xf32>, vector<8x8xf32>, vector<8x8xf32> -> vector<8x8xf32>
    %cst_102 = arith.constant dense<0xFF800000> : vector<8xf32>
    %209 = vector.multi_reduction <maximumf>, %208, %cst_102 [1] : vector<8x8xf32> to vector<8xf32>
    %210 = vector.shape_cast %209 : vector<8xf32> to vector<8x1xf32>
    %211 = vector.broadcast %210 : vector<8x1xf32> to vector<8x8xf32>
    %212 = arith.subf %208, %211 : vector<8x8xf32>
    %213 = math.exp %212 : vector<8x8xf32>
    %cst_103 = arith.constant dense<0.000000e+00> : vector<8xf32>
    %214 = vector.multi_reduction <add>, %213, %cst_103 [1] : vector<8x8xf32> to vector<8xf32>
    %215 = vector.shape_cast %214 : vector<8xf32> to vector<8x1xf32>
    %216 = tpu.reciprocal %215 {approx = true} : vector<8x1xf32> -> vector<8x1xf32>
    %217 = vector.broadcast %216 : vector<8x1xf32> to vector<8x8xf32>
    %218 = arith.mulf %213, %217 : vector<8x8xf32>
    %cst_104 = arith.constant dense<0.000000e+00> : vector<8x8xf32>
    %219 = tpu.matmul %218, %207, %cst_104 {dimension_numbers = #tpu.dot_dimension_numbers<[1], [0], [0], [1], [0, 0, 1, 1], [], []>} : vector<8x8xf32>, vector<8x8xf32>, vector<8x8xf32> -> vector<8x8xf32>
    %220 = arith.truncf %219 : vector<8x8xf32> to vector<8x8xbf16>
    %c1_105 = arith.constant 1 : index
    %c0_106 = arith.constant 0 : index
    %c0_107 = arith.constant 0 : index
    %c0_108 = arith.constant 0 : index
    %221 = vector.load %arg4[%c1_105, %c0_106, %c0_107, %c0_108] : memref<2x4x8x32xbf16, #tpu.memory_space<vmem>>, vector<1x1x8x32xbf16>
    %222 = vector.shape_cast %221 : vector<1x1x8x32xbf16> to vector<8x32xbf16>
    %cst_109 = arith.constant dense<0.000000e+00> : vector<8x32xf32>
    %223 = tpu.matmul %220, %222, %cst_109 {dimension_numbers = #tpu.dot_dimension_numbers<[1], [0], [0], [1], [0, 0, 1, 1], [], []>} : vector<8x8xbf16>, vector<8x32xbf16>, vector<8x32xf32> -> vector<8x32xf32>
    %224 = arith.addf %204, %223 : vector<8x32xf32>
    %225 = vector.extract_strided_slice %203 {offsets = [0, 8], sizes = [8, 8], strides = [1, 1]} : vector<8x96xf32> to vector<8x8xf32>
    %226 = vector.extract_strided_slice %203 {offsets = [0, 40], sizes = [8, 8], strides = [1, 1]} : vector<8x96xf32> to vector<8x8xf32>
    %227 = vector.extract_strided_slice %203 {offsets = [0, 72], sizes = [8, 8], strides = [1, 1]} : vector<8x96xf32> to vector<8x8xf32>
    %cst_110 = arith.constant dense<0.000000e+00> : vector<8x8xf32>
    %228 = tpu.matmul %225, %226, %cst_110 {dimension_numbers = #tpu.dot_dimension_numbers<[1], [1], [0], [0], [0, 0, 1, 0], [], []>} : vector<8x8xf32>, vector<8x8xf32>, vector<8x8xf32> -> vector<8x8xf32>
    %cst_111 = arith.constant dense<0xFF800000> : vector<8xf32>
    %229 = vector.multi_reduction <maximumf>, %228, %cst_111 [1] : vector<8x8xf32> to vector<8xf32>
    %230 = vector.shape_cast %229 : vector<8xf32> to vector<8x1xf32>
    %231 = vector.broadcast %230 : vector<8x1xf32> to vector<8x8xf32>
    %232 = arith.subf %228, %231 : vector<8x8xf32>
    %233 = math.exp %232 : vector<8x8xf32>
    %cst_112 = arith.constant dense<0.000000e+00> : vector<8xf32>
    %234 = vector.multi_reduction <add>, %233, %cst_112 [1] : vector<8x8xf32> to vector<8xf32>
    %235 = vector.shape_cast %234 : vector<8xf32> to vector<8x1xf32>
    %236 = tpu.reciprocal %235 {approx = true} : vector<8x1xf32> -> vector<8x1xf32>
    %237 = vector.broadcast %236 : vector<8x1xf32> to vector<8x8xf32>
    %238 = arith.mulf %233, %237 : vector<8x8xf32>
    %cst_113 = arith.constant dense<0.000000e+00> : vector<8x8xf32>
    %239 = tpu.matmul %238, %227, %cst_113 {dimension_numbers = #tpu.dot_dimension_numbers<[1], [0], [0], [1], [0, 0, 1, 1], [], []>} : vector<8x8xf32>, vector<8x8xf32>, vector<8x8xf32> -> vector<8x8xf32>
    %240 = arith.truncf %239 : vector<8x8xf32> to vector<8x8xbf16>
    %c1_114 = arith.constant 1 : index
    %c1_115 = arith.constant 1 : index
    %c0_116 = arith.constant 0 : index
    %c0_117 = arith.constant 0 : index
    %241 = vector.load %arg4[%c1_114, %c1_115, %c0_116, %c0_117] : memref<2x4x8x32xbf16, #tpu.memory_space<vmem>>, vector<1x1x8x32xbf16>
    %242 = vector.shape_cast %241 : vector<1x1x8x32xbf16> to vector<8x32xbf16>
    %cst_118 = arith.constant dense<0.000000e+00> : vector<8x32xf32>
    %243 = tpu.matmul %240, %242, %cst_118 {dimension_numbers = #tpu.dot_dimension_numbers<[1], [0], [0], [1], [0, 0, 1, 1], [], []>} : vector<8x8xbf16>, vector<8x32xbf16>, vector<8x32xf32> -> vector<8x32xf32>
    %244 = arith.addf %224, %243 : vector<8x32xf32>
    %245 = vector.extract_strided_slice %203 {offsets = [0, 16], sizes = [8, 8], strides = [1, 1]} : vector<8x96xf32> to vector<8x8xf32>
    %246 = vector.extract_strided_slice %203 {offsets = [0, 48], sizes = [8, 8], strides = [1, 1]} : vector<8x96xf32> to vector<8x8xf32>
    %247 = vector.extract_strided_slice %203 {offsets = [0, 80], sizes = [8, 8], strides = [1, 1]} : vector<8x96xf32> to vector<8x8xf32>
    %cst_119 = arith.constant dense<0.000000e+00> : vector<8x8xf32>
    %248 = tpu.matmul %245, %246, %cst_119 {dimension_numbers = #tpu.dot_dimension_numbers<[1], [1], [0], [0], [0, 0, 1, 0], [], []>} : vector<8x8xf32>, vector<8x8xf32>, vector<8x8xf32> -> vector<8x8xf32>
    %cst_120 = arith.constant dense<0xFF800000> : vector<8xf32>
    %249 = vector.multi_reduction <maximumf>, %248, %cst_120 [1] : vector<8x8xf32> to vector<8xf32>
    %250 = vector.shape_cast %249 : vector<8xf32> to vector<8x1xf32>
    %251 = vector.broadcast %250 : vector<8x1xf32> to vector<8x8xf32>
    %252 = arith.subf %248, %251 : vector<8x8xf32>
    %253 = math.exp %252 : vector<8x8xf32>
    %cst_121 = arith.constant dense<0.000000e+00> : vector<8xf32>
    %254 = vector.multi_reduction <add>, %253, %cst_121 [1] : vector<8x8xf32> to vector<8xf32>
    %255 = vector.shape_cast %254 : vector<8xf32> to vector<8x1xf32>
    %256 = tpu.reciprocal %255 {approx = true} : vector<8x1xf32> -> vector<8x1xf32>
    %257 = vector.broadcast %256 : vector<8x1xf32> to vector<8x8xf32>
    %258 = arith.mulf %253, %257 : vector<8x8xf32>
    %cst_122 = arith.constant dense<0.000000e+00> : vector<8x8xf32>
    %259 = tpu.matmul %258, %247, %cst_122 {dimension_numbers = #tpu.dot_dimension_numbers<[1], [0], [0], [1], [0, 0, 1, 1], [], []>} : vector<8x8xf32>, vector<8x8xf32>, vector<8x8xf32> -> vector<8x8xf32>
    %260 = arith.truncf %259 : vector<8x8xf32> to vector<8x8xbf16>
    %c1_123 = arith.constant 1 : index
    %c2_124 = arith.constant 2 : index
    %c0_125 = arith.constant 0 : index
    %c0_126 = arith.constant 0 : index
    %261 = vector.load %arg4[%c1_123, %c2_124, %c0_125, %c0_126] : memref<2x4x8x32xbf16, #tpu.memory_space<vmem>>, vector<1x1x8x32xbf16>
    %262 = vector.shape_cast %261 : vector<1x1x8x32xbf16> to vector<8x32xbf16>
    %cst_127 = arith.constant dense<0.000000e+00> : vector<8x32xf32>
    %263 = tpu.matmul %260, %262, %cst_127 {dimension_numbers = #tpu.dot_dimension_numbers<[1], [0], [0], [1], [0, 0, 1, 1], [], []>} : vector<8x8xbf16>, vector<8x32xbf16>, vector<8x32xf32> -> vector<8x32xf32>
    %264 = arith.addf %244, %263 : vector<8x32xf32>
    %265 = vector.extract_strided_slice %203 {offsets = [0, 24], sizes = [8, 8], strides = [1, 1]} : vector<8x96xf32> to vector<8x8xf32>
    %266 = vector.extract_strided_slice %203 {offsets = [0, 56], sizes = [8, 8], strides = [1, 1]} : vector<8x96xf32> to vector<8x8xf32>
    %267 = vector.extract_strided_slice %203 {offsets = [0, 88], sizes = [8, 8], strides = [1, 1]} : vector<8x96xf32> to vector<8x8xf32>
    %cst_128 = arith.constant dense<0.000000e+00> : vector<8x8xf32>
    %268 = tpu.matmul %265, %266, %cst_128 {dimension_numbers = #tpu.dot_dimension_numbers<[1], [1], [0], [0], [0, 0, 1, 0], [], []>} : vector<8x8xf32>, vector<8x8xf32>, vector<8x8xf32> -> vector<8x8xf32>
    %cst_129 = arith.constant dense<0xFF800000> : vector<8xf32>
    %269 = vector.multi_reduction <maximumf>, %268, %cst_129 [1] : vector<8x8xf32> to vector<8xf32>
    %270 = vector.shape_cast %269 : vector<8xf32> to vector<8x1xf32>
    %271 = vector.broadcast %270 : vector<8x1xf32> to vector<8x8xf32>
    %272 = arith.subf %268, %271 : vector<8x8xf32>
    %273 = math.exp %272 : vector<8x8xf32>
    %cst_130 = arith.constant dense<0.000000e+00> : vector<8xf32>
    %274 = vector.multi_reduction <add>, %273, %cst_130 [1] : vector<8x8xf32> to vector<8xf32>
    %275 = vector.shape_cast %274 : vector<8xf32> to vector<8x1xf32>
    %276 = tpu.reciprocal %275 {approx = true} : vector<8x1xf32> -> vector<8x1xf32>
    %277 = vector.broadcast %276 : vector<8x1xf32> to vector<8x8xf32>
    %278 = arith.mulf %273, %277 : vector<8x8xf32>
    %cst_131 = arith.constant dense<0.000000e+00> : vector<8x8xf32>
    %279 = tpu.matmul %278, %267, %cst_131 {dimension_numbers = #tpu.dot_dimension_numbers<[1], [0], [0], [1], [0, 0, 1, 1], [], []>} : vector<8x8xf32>, vector<8x8xf32>, vector<8x8xf32> -> vector<8x8xf32>
    %280 = arith.truncf %279 : vector<8x8xf32> to vector<8x8xbf16>
    %c1_132 = arith.constant 1 : index
    %c3_133 = arith.constant 3 : index
    %c0_134 = arith.constant 0 : index
    %c0_135 = arith.constant 0 : index
    %281 = vector.load %arg4[%c1_132, %c3_133, %c0_134, %c0_135] : memref<2x4x8x32xbf16, #tpu.memory_space<vmem>>, vector<1x1x8x32xbf16>
    %282 = vector.shape_cast %281 : vector<1x1x8x32xbf16> to vector<8x32xbf16>
    %cst_136 = arith.constant dense<0.000000e+00> : vector<8x32xf32>
    %283 = tpu.matmul %280, %282, %cst_136 {dimension_numbers = #tpu.dot_dimension_numbers<[1], [0], [0], [1], [0, 0, 1, 1], [], []>} : vector<8x8xbf16>, vector<8x32xbf16>, vector<8x32xf32> -> vector<8x32xf32>
    %284 = arith.addf %264, %283 : vector<8x32xf32>
    %285 = arith.addf %168, %284 : vector<8x32xf32>
    %c1_137 = arith.constant 1 : index
    %c0_138 = arith.constant 0 : index
    %c0_139 = arith.constant 0 : index
    %286 = vector.load %arg5[%c1_137, %c0_138, %c0_139] : memref<2x1x32xf32, #tpu.memory_space<vmem>>, vector<1x1x32xf32>
    %287 = vector.shape_cast %286 : vector<1x1x32xf32> to vector<1x32xf32>
    %288 = vector.broadcast %287 : vector<1x32xf32> to vector<8x32xf32>
    %289 = arith.addf %285, %288 : vector<8x32xf32>
    %c1_140 = arith.constant 1 : index
    %c0_141 = arith.constant 0 : index
    %c0_142 = arith.constant 0 : index
    %290 = vector.load %arg12[%c1_140, %c0_141, %c0_142] : memref<2x1x32xf32, #tpu.memory_space<vmem>>, vector<1x1x32xf32>
    %291 = vector.shape_cast %290 : vector<1x1x32xf32> to vector<1x32xf32>
    %c1_143 = arith.constant 1 : index
    %c0_144 = arith.constant 0 : index
    %c0_145 = arith.constant 0 : index
    %292 = vector.load %arg13[%c1_143, %c0_144, %c0_145] : memref<2x1x32xf32, #tpu.memory_space<vmem>>, vector<1x1x32xf32>
    %293 = vector.shape_cast %292 : vector<1x1x32xf32> to vector<1x32xf32>
    %cst_146 = arith.constant dense<0.000000e+00> : vector<8xf32>
    %294 = vector.multi_reduction <add>, %289, %cst_146 [1] : vector<8x32xf32> to vector<8xf32>
    %295 = vector.shape_cast %294 : vector<8xf32> to vector<8x1xf32>
    %cst_147 = arith.constant 3.200000e+01 : f32
    %296 = vector.broadcast %cst_147 : f32 to vector<8x1xf32>
    %297 = arith.divf %295, %296 : vector<8x1xf32>
    %298 = vector.broadcast %297 : vector<8x1xf32> to vector<8x32xf32>
    %299 = arith.subf %289, %298 : vector<8x32xf32>
    %300 = arith.mulf %299, %299 : vector<8x32xf32>
    %cst_148 = arith.constant dense<0.000000e+00> : vector<8xf32>
    %301 = vector.multi_reduction <add>, %300, %cst_148 [1] : vector<8x32xf32> to vector<8xf32>
    %302 = vector.shape_cast %301 : vector<8xf32> to vector<8x1xf32>
    %cst_149 = arith.constant 3.100000e+01 : f32
    %303 = vector.broadcast %cst_149 : f32 to vector<8x1xf32>
    %304 = arith.divf %302, %303 : vector<8x1xf32>
    %305 = math.sqrt %304 : vector<8x1xf32>
    %cst_150 = arith.constant 9.99999997E-7 : f32
    %306 = vector.broadcast %cst_150 : f32 to vector<8x1xf32>
    %307 = arith.addf %305, %306 : vector<8x1xf32>
    %308 = tpu.reciprocal %307 : vector<8x1xf32> -> vector<8x1xf32>
    %309 = vector.broadcast %297 : vector<8x1xf32> to vector<8x32xf32>
    %310 = arith.subf %289, %309 : vector<8x32xf32>
    %311 = vector.broadcast %291 : vector<1x32xf32> to vector<8x32xf32>
    %312 = arith.mulf %311, %310 : vector<8x32xf32>
    %313 = vector.broadcast %308 : vector<8x1xf32> to vector<8x32xf32>
    %314 = arith.mulf %312, %313 : vector<8x32xf32>
    %315 = vector.broadcast %293 : vector<1x32xf32> to vector<8x32xf32>
    %316 = arith.addf %314, %315 : vector<8x32xf32>
    %317 = arith.truncf %316 : vector<8x32xf32> to vector<8x32xbf16>
    %c1_151 = arith.constant 1 : index
    %c0_152 = arith.constant 0 : index
    %c0_153 = arith.constant 0 : index
    %318 = vector.load %arg8[%c1_151, %c0_152, %c0_153] : memref<2x32x64xbf16, #tpu.memory_space<vmem>>, vector<1x32x64xbf16>
    %319 = vector.shape_cast %318 : vector<1x32x64xbf16> to vector<32x64xbf16>
    %cst_154 = arith.constant dense<0.000000e+00> : vector<8x64xf32>
    %320 = tpu.matmul %317, %319, %cst_154 {dimension_numbers = #tpu.dot_dimension_numbers<[1], [0], [0], [1], [0, 0, 1, 1], [], []>} : vector<8x32xbf16>, vector<32x64xbf16>, vector<8x64xf32> -> vector<8x64xf32>
    %c1_155 = arith.constant 1 : index
    %c0_156 = arith.constant 0 : index
    %c0_157 = arith.constant 0 : index
    %321 = vector.load %arg9[%c1_155, %c0_156, %c0_157] : memref<2x1x64xf32, #tpu.memory_space<vmem>>, vector<1x1x64xf32>
    %322 = vector.shape_cast %321 : vector<1x1x64xf32> to vector<1x64xf32>
    %323 = vector.broadcast %322 : vector<1x64xf32> to vector<8x64xf32>
    %324 = arith.addf %320, %323 : vector<8x64xf32>
    %cst_158 = arith.constant 0.000000e+00 : f32
    %325 = vector.broadcast %cst_158 : f32 to vector<8x64xf32>
    %326 = arith.maximumf %324, %325 : vector<8x64xf32>
    %327 = arith.truncf %326 : vector<8x64xf32> to vector<8x64xbf16>
    %c1_159 = arith.constant 1 : index
    %c0_160 = arith.constant 0 : index
    %c0_161 = arith.constant 0 : index
    %328 = vector.load %arg10[%c1_159, %c0_160, %c0_161] : memref<2x64x32xbf16, #tpu.memory_space<vmem>>, vector<1x64x32xbf16>
    %329 = vector.shape_cast %328 : vector<1x64x32xbf16> to vector<64x32xbf16>
    %cst_162 = arith.constant dense<0.000000e+00> : vector<8x32xf32>
    %330 = tpu.matmul %327, %329, %cst_162 {dimension_numbers = #tpu.dot_dimension_numbers<[1], [0], [0], [1], [0, 0, 1, 1], [], []>} : vector<8x64xbf16>, vector<64x32xbf16>, vector<8x32xf32> -> vector<8x32xf32>
    %331 = arith.addf %289, %330 : vector<8x32xf32>
    %c1_163 = arith.constant 1 : index
    %c0_164 = arith.constant 0 : index
    %c0_165 = arith.constant 0 : index
    %332 = vector.load %arg11[%c1_163, %c0_164, %c0_165] : memref<2x1x32xf32, #tpu.memory_space<vmem>>, vector<1x1x32xf32>
    %333 = vector.shape_cast %332 : vector<1x1x32xf32> to vector<1x32xf32>
    %334 = vector.broadcast %333 : vector<1x32xf32> to vector<8x32xf32>
    %335 = arith.addf %331, %334 : vector<8x32xf32>
    %c0_166 = arith.constant 0 : index
    %c0_167 = arith.constant 0 : index
    %336 = vector.load %arg14[%c0_166, %c0_167] : memref<1x32xf32, #tpu.memory_space<vmem>>, vector<1x32xf32>
    %c0_168 = arith.constant 0 : index
    %c0_169 = arith.constant 0 : index
    %337 = vector.load %arg15[%c0_168, %c0_169] : memref<1x32xf32, #tpu.memory_space<vmem>>, vector<1x32xf32>
    %cst_170 = arith.constant dense<0.000000e+00> : vector<8xf32>
    %338 = vector.multi_reduction <add>, %335, %cst_170 [1] : vector<8x32xf32> to vector<8xf32>
    %339 = vector.shape_cast %338 : vector<8xf32> to vector<8x1xf32>
    %cst_171 = arith.constant 3.200000e+01 : f32
    %340 = vector.broadcast %cst_171 : f32 to vector<8x1xf32>
    %341 = arith.divf %339, %340 : vector<8x1xf32>
    %342 = vector.broadcast %341 : vector<8x1xf32> to vector<8x32xf32>
    %343 = arith.subf %335, %342 : vector<8x32xf32>
    %344 = arith.mulf %343, %343 : vector<8x32xf32>
    %cst_172 = arith.constant dense<0.000000e+00> : vector<8xf32>
    %345 = vector.multi_reduction <add>, %344, %cst_172 [1] : vector<8x32xf32> to vector<8xf32>
    %346 = vector.shape_cast %345 : vector<8xf32> to vector<8x1xf32>
    %cst_173 = arith.constant 3.100000e+01 : f32
    %347 = vector.broadcast %cst_173 : f32 to vector<8x1xf32>
    %348 = arith.divf %346, %347 : vector<8x1xf32>
    %349 = math.sqrt %348 : vector<8x1xf32>
    %cst_174 = arith.constant 9.99999997E-7 : f32
    %350 = vector.broadcast %cst_174 : f32 to vector<8x1xf32>
    %351 = arith.addf %349, %350 : vector<8x1xf32>
    %352 = tpu.reciprocal %351 : vector<8x1xf32> -> vector<8x1xf32>
    %353 = vector.broadcast %341 : vector<8x1xf32> to vector<8x32xf32>
    %354 = arith.subf %335, %353 : vector<8x32xf32>
    %355 = vector.broadcast %336 : vector<1x32xf32> to vector<8x32xf32>
    %356 = arith.mulf %355, %354 : vector<8x32xf32>
    %357 = vector.broadcast %352 : vector<8x1xf32> to vector<8x32xf32>
    %358 = arith.mulf %356, %357 : vector<8x32xf32>
    %359 = vector.broadcast %337 : vector<1x32xf32> to vector<8x32xf32>
    %360 = arith.addf %358, %359 : vector<8x32xf32>
    %c0_175 = arith.constant 0 : index
    %c0_176 = arith.constant 0 : index
    %c0_177 = arith.constant 0 : index
    %361 = vector.load %arg16[%c0_175, %c0_176, %c0_177] : memref<1x8x32xf32, #tpu.memory_space<vmem>>, vector<1x8x32xf32>
    %362 = vector.shape_cast %361 : vector<1x8x32xf32> to vector<8x32xf32>
    %363 = vector.shape_cast %360 : vector<8x32xf32> to vector<1x8x32xf32>
    tpu.vector_store %arg16[%c0_175, %c0_176, %c0_177], %363 {strides = array<i32>} : memref<1x8x32xf32, #tpu.memory_space<vmem>>, vector<1x8x32xf32>,
    return
  }
  func.func @transform_0(%arg0: i32) -> (i32, i32, i32) {
    %c0_i32 = arith.constant 0 : i32
    %c0_i32_0 = arith.constant 0 : i32
    %c0_i32_1 = arith.constant 0 : i32
    return %arg0, %c0_i32, %c0_i32_0 : i32, i32, i32
  }
  func.func @transform_1(%arg0: i32) -> (i32, i32, i32) {
    %c0_i32 = arith.constant 0 : i32
    %c0_i32_0 = arith.constant 0 : i32
    %c0_i32_1 = arith.constant 0 : i32
    %c0_i32_2 = arith.constant 0 : i32
    return %c0_i32, %c0_i32_0, %c0_i32_1 : i32, i32, i32
  }
  func.func @transform_2(%arg0: i32) -> (i32, i32, i32) {
    %c0_i32 = arith.constant 0 : i32
    %c0_i32_0 = arith.constant 0 : i32
    %c0_i32_1 = arith.constant 0 : i32
    %c0_i32_2 = arith.constant 0 : i32
    return %c0_i32, %c0_i32_0, %c0_i32_1 : i32, i32, i32
  }
  func.func @transform_3(%arg0: i32) -> (i32, i32, i32, i32) {
    %c0_i32 = arith.constant 0 : i32
    %c0_i32_0 = arith.constant 0 : i32
    %c0_i32_1 = arith.constant 0 : i32
    %c0_i32_2 = arith.constant 0 : i32
    %c0_i32_3 = arith.constant 0 : i32
    return %c0_i32, %c0_i32_0, %c0_i32_1, %c0_i32_2 : i32, i32, i32, i32
  }
  func.func @transform_4(%arg0: i32) -> (i32, i32, i32) {
    %c0_i32 = arith.constant 0 : i32
    %c0_i32_0 = arith.constant 0 : i32
    %c0_i32_1 = arith.constant 0 : i32
    %c0_i32_2 = arith.constant 0 : i32
    return %c0_i32, %c0_i32_0, %c0_i32_1 : i32, i32, i32
  }
  func.func @transform_5(%arg0: i32) -> (i32, i32, i32) {
    %c0_i32 = arith.constant 0 : i32
    %c0_i32_0 = arith.constant 0 : i32
    %c0_i32_1 = arith.constant 0 : i32
    %c0_i32_2 = arith.constant 0 : i32
    return %c0_i32, %c0_i32_0, %c0_i32_1 : i32, i32, i32
  }
  func.func @transform_6(%arg0: i32) -> (i32, i32, i32) {
    %c0_i32 = arith.constant 0 : i32
    %c0_i32_0 = arith.constant 0 : i32
    %c0_i32_1 = arith.constant 0 : i32
    %c0_i32_2 = arith.constant 0 : i32
    return %c0_i32, %c0_i32_0, %c0_i32_1 : i32, i32, i32
  }
  func.func @transform_7(%arg0: i32) -> (i32, i32, i32) {
    %c0_i32 = arith.constant 0 : i32
    %c0_i32_0 = arith.constant 0 : i32
    %c0_i32_1 = arith.constant 0 : i32
    %c0_i32_2 = arith.constant 0 : i32
    return %c0_i32, %c0_i32_0, %c0_i32_1 : i32, i32, i32
  }
  func.func @transform_8(%arg0: i32) -> (i32, i32, i32) {
    %c0_i32 = arith.constant 0 : i32
    %c0_i32_0 = arith.constant 0 : i32
    %c0_i32_1 = arith.constant 0 : i32
    %c0_i32_2 = arith.constant 0 : i32
    return %c0_i32, %c0_i32_0, %c0_i32_1 : i32, i32, i32
  }
  func.func @transform_9(%arg0: i32) -> (i32, i32, i32) {
    %c0_i32 = arith.constant 0 : i32
    %c0_i32_0 = arith.constant 0 : i32
    %c0_i32_1 = arith.constant 0 : i32
    %c0_i32_2 = arith.constant 0 : i32
    return %c0_i32, %c0_i32_0, %c0_i32_1 : i32, i32, i32
  }
  func.func @transform_10(%arg0: i32) -> (i32, i32, i32) {
    %c0_i32 = arith.constant 0 : i32
    %c0_i32_0 = arith.constant 0 : i32
    %c0_i32_1 = arith.constant 0 : i32
    %c0_i32_2 = arith.constant 0 : i32
    return %c0_i32, %c0_i32_0, %c0_i32_1 : i32, i32, i32
  }
  func.func @transform_11(%arg0: i32) -> (i32, i32, i32) {
    %c0_i32 = arith.constant 0 : i32
    %c0_i32_0 = arith.constant 0 : i32
    %c0_i32_1 = arith.constant 0 : i32
    %c0_i32_2 = arith.constant 0 : i32
    return %c0_i32, %c0_i32_0, %c0_i32_1 : i32, i32, i32
  }
  func.func @transform_12(%arg0: i32) -> (i32, i32, i32) {
    %c0_i32 = arith.constant 0 : i32
    %c0_i32_0 = arith.constant 0 : i32
    %c0_i32_1 = arith.constant 0 : i32
    %c0_i32_2 = arith.constant 0 : i32
    return %c0_i32, %c0_i32_0, %c0_i32_1 : i32, i32, i32
  }
  func.func @transform_13(%arg0: i32) -> (i32, i32) {
    %c0_i32 = arith.constant 0 : i32
    %c0_i32_0 = arith.constant 0 : i32
    %c0_i32_1 = arith.constant 0 : i32
    return %c0_i32, %c0_i32_0 : i32, i32
  }
  func.func @transform_14(%arg0: i32) -> (i32, i32) {
    %c0_i32 = arith.constant 0 : i32
    %c0_i32_0 = arith.constant 0 : i32
    %c0_i32_1 = arith.constant 0 : i32
    return %c0_i32, %c0_i32_0 : i32, i32
  }
  func.func @transform_15(%arg0: i32) -> (i32, i32, i32) {
    %c0_i32 = arith.constant 0 : i32
    %c0_i32_0 = arith.constant 0 : i32
    %c0_i32_1 = arith.constant 0 : i32
    return %arg0, %c0_i32, %c0_i32_0 : i32, i32, i32
  }
}

</mosaic_0001>

<bundles_post_ra>
// kernel: encoder_forward.1
= control target key start
LH: loop header
LB: loop body
LE: loop exit
PB: predicated region body
PF: predicated region fallthrough
CT: control target
= control target key end

     0   :  { %s4026_s0 = inlined_call_operand.vmem [shape: f32[2,8,32], index: 0, kind: input, shape index: {}]   ;;  %s4027_s1 = inlined_call_operand.vmem [shape: bf16[2,32,96], index: 1, kind: input, shape index: {}]   ;;  %s4028_s2 = inlined_call_operand.vmem [shape: f32[2,1,96], index: 2, kind: input, shape index: {}]   ;;  %s4029_s3 = inlined_call_operand.vmem [shape: bf16[2,4,8,32], index: 3, kind: input, shape index: {}]   ;;  %s4030_s4 = inlined_call_operand.vmem [shape: f32[2,1,32], index: 4, kind: input, shape index: {}]   ;;  %s4031_s5 = inlined_call_operand.vmem [shape: f32[2,1,32], index: 5, kind: input, shape index: {}]   ;;  %s4032_s6 = inlined_call_operand.vmem [shape: f32[2,1,32], index: 6, kind: input, shape index: {}]   ;;  %s4033_s7 = inlined_call_operand.vmem [shape: bf16[2,32,64], index: 7, kind: input, shape index: {}]   ;;  %s4034_s8 = inlined_call_operand.vmem [shape: f32[2,1,64], index: 8, kind: input, shape index: {}]   ;;  %s4035_s9 = inlined_call_operand.vmem [shape: bf16[2,64,32], index: 9, kind: input, shape index: {}]   ;;  %s4036_s10 = inlined_call_operand.vmem [shape: f32[2,1,32], index: 10, kind: input, shape index: {}]   ;;  %s4037_s11 = inlined_call_operand.vmem [shape: f32[2,1,32], index: 11, kind: input, shape index: {}]   ;;  %s4038_s12 = inlined_call_operand.vmem [shape: f32[2,1,32], index: 12, kind: input, shape index: {}]   ;;  %s4039_s13 = inlined_call_operand.vmem [shape: f32[1,32], index: 13, kind: input, shape index: {}]   ;;  %s4040_s14 = inlined_call_operand.vmem [shape: f32[1,32], index: 14, kind: input, shape index: {}]   ;;  %s4041_s15 = inlined_call_operand.hbm [shape: f32[2,8,32], index: 15, kind: output, shape index: {}]  }
   0x1   :  { %4053 = sst [smem:[#allocation6_spill]] %s4026_s0 }
   0x2   :  { %4054 = sst [smem:[#allocation7_spill]] %s4027_s1 }
   0x3   :  { %4055 = sst [smem:[#allocation8_spill]] %s4028_s2 }
   0x4   :  { %4056 = sst [smem:[#allocation9_spill]] %s4029_s3 }
   0x5   :  { %4057 = sst [smem:[#allocation10_spill]] %s4030_s4 }
   0x6   :  { %20 = vsyncpa [#allocation3], 0 }
   0x7   :  { %22 = vsyncpa [#allocation3 + $0x1], 0  ;;  %s3577_s18 = smov 0   ;;  %s3579_s19 = smov 0  }
   0x8   :  { %s3581_s20 = smov 0   ;;  %s3583_s21 = smov 0  }
   0x9 LB: > { %s3598_s22 = sadd.s32 4294967295, %s3481_s21   ;;  %s2934_s23 = sadd.s32 4294967294, %s3481_s21   ;;  %s3481_s21 = sphi %s3583_s21, %s4081_s21   ;;  %s3477_s20 = sphi %s3581_s20, %s4080_s20   ;;  %s3473_s19 = sphi %s3579_s19, %s4079_s19   ;;  %s3469_s18 = sphi %s3577_s18, %s4078_s18  }
   0xa   : > { %s3602_s24 = sadd.s32 1, %s3481_s21   ;;  %s355_s25 = sadd.s32 1, %s3477_s20 }
   0xb   : > { %s352_s26 = ssub.s32 %s3481_s21, %s3602_s24  ;;  %p365_p0 = scmp.ne.s32.totalorder %s3477_s20, %s3473_s19 }
   0xc   : > { %p353_p1 = scmp.eq.s32.totalorder %s352_s26, 0  ;;  %p366_p2 = scmp.eq.s32.totalorder %s3598_s22, 1 }
   0xd   : > { %p371_p3 = scmp.ne.s32.totalorder %s3473_s19, %s3469_s18  ;;  %p372_p4 = scmp.eq.s32.totalorder %s2934_s23, 1 }
   0xe   : > { %s3613_s27 = scalar_select %p353_p1, %s3477_s20, %s355_s25  }
   0xf   : > { %p3615_p5 = por %p366_p2, %p365_p0  ;;  %p3619_p6 = por %p372_p4, %p371_p3 }
  0x10   : > { %4058 = sst [smem:[#allocation5_spill]] %s3613_s27  ;;  %p2937_p7 = scmp.ge.s32.totalorder %s3481_s21, 1 }
  0x11   : > { %p439_p8 = scmp.lt.s32.totalorder %s3481_s21, 3 }
  0x13   : > { %p440_p9 = pnand %p2937_p7, %p439_p8 }
  0x14   : > { %p486_p10 = scmp.lt.s32.totalorder (!%p440_p9), %s3598_s22, 1  ;;  %s4061_s0 = sld [smem:[#allocation6_spill]] (!%p440_p9) }
  0x15   : > { %443 = sbr.rel (%p440_p9) target bundleno = 7835 (0x1e9b), region = 80  ;;  %s4062_s1 = sld [smem:[#allocation7_spill]] (!%p440_p9) }
  0x16   : > { %s4063_s2 = sld [smem:[#allocation8_spill]] (!%p440_p9)  ;;  %s4042_s23 = smov (!%p440_p9), 64  }
  0x17   : > { %s4052_s26 = smov (!%p440_p9), 88   ;;  %s4044_s17 = smov (!%p440_p9), 80  }
  0x18   : > { %s4064_s3 = sld [smem:[#allocation9_spill]] (!%p440_p9)  ;;  %s4070_s27 = smov (!%p440_p9), 80  }
  0x19   : > { %s4065_s4 = sld [smem:[#allocation10_spill]] (!%p440_p9) }
  0x1a   : > { %s487_s30 = scalar_select %p486_p10, %s3598_s22, 1  ;;  %vm494_vm0 = vcmask 261120   ;;  %v3483_v8 = vmov 0.0   ;;  %vm3484_vm1 = vmmov 0   ;;  %v2940_v18 = vld [vmem:[%s4031_s5] ss:$0 sm:$0xff] }
  0x1b   : > { %v3353_v7 = vld [vmem:[%s4062_s1 + $0x8] sm:$0xff]   ;;  %3117 = vmatprep.subr.bf16.mxu0 %v3483_v8  ;;  %3121 = vmatprep.mubr.msk.bf16.mxu0 %vm3484_vm1, %v3483_v8  ;;  %v3354_v9 = vld [vmem:[%s4062_s1] sm:$0xff]   ;;  %vm601_vm4 = vcmask 64512   ;;  %vm936_vm5 = vcmask 1043456   ;;  %vm1602_vm8 = vcmask 523264  }
  0x1c   : > { %s2939_s16 = sshll.u32 %s487_s30, 3  ;;  %3118 = vmatpush3.bf16.msra.mxu0 %v3353_v7  ;;  %3125 = vmatprep.subr.mxu1 %v3483_v8  ;;  %v2941_v21 = vld [vmem:[%s4032_s6] ss:$0 sm:$0xff]  ;;  %s4045_s30 = smov 120  }
  0x1d   : > { %s489_s25 = scalar_lea.vmem %s4061_s0, %s2939_s16  ;;  %3119 = vmatprep.subr.bf16.mxu0 %v3483_v8  ;;  %3127 = vmatprep.mubr.msk.f32.mxu1 %vm3484_vm1, %v3483_v8  ;;  %v2942_v25 = vld [vmem:[%s4063_s2] ss:$0 sm:$0xff]  ;;  %s4043_s16 = smov 56  }
  0x1e   : > { %v3630_v0 = vld [vmem:[%s489_s25] sm:$0xff]  ;;  %s4047_s25 = smov 96   ;;  %s4069_s0 = smov 56  }
  0x1f   : > { %v495_v1 = vsel %vm494_vm0, %v3630_v0, 0.0  ;;  %v2952_v57 = vld [vmem:[%s4064_s3 + $0x4] sm:$0xf]  ;;  %v764_v60 = vld [vmem:[%s4064_s3] sm:$0xf] }
  0x20   : > { %496 = vadd.xlane.f32.xlu0 %v495_v1  ;;  %3120 = vmatpush3.bf16.msra.mxu0 %v3354_v9  ;;  %v938_v58 = vsel %vm936_vm5, %v2952_v57, 0  ;;  %v984_v63 = vsel %vm936_vm5, %v764_v60, 0  ;;  %v2965_v60 = vld [vmem:[%s4065_s4] ss:$0 sm:$0xff] }
  0x21   : > { %3140 = vmatprep.subr.mxu0 %v3483_v8 }
  0xa9   : > { %v497_v2 = vpop.xlane.xlu0 %496 }
  0xaa   : > { %v499_v3 = vmul.f32 0.03125, %v497_v2 }
  0xac   : > { %v500_v4 = vsub.f32 %v3630_v0, %v499_v3 }
  0xae   : > { %v501_v5 = vmul.f32 %v500_v4, %v500_v4  ;;  %v522_v19 = vmul.f32 %v2940_v18, %v500_v4 }
  0xb0   : > { %v502_v6 = vsel %vm494_vm0, %v501_v5, 0.0 }
  0xb1   : > { %503 = vadd.xlane.f32.xlu0 %v502_v6 }
 0x13a   : > { %v504_v10 = vpop.xlane.xlu0 %503 }
 0x13b   : > { %v506_v11 = vmul.f32 0.032258064, %v504_v10 }
 0x13d   : > { %3369 = vrsqrt.f32 %v506_v11  ;;  %vm509_vm2 = vcmp.eq.f32.partialorder %v506_v11, inf  ;;  %v512_v14 = vand.u32 2147483648, %v506_v11  ;;  %vm511_vm3 = vcmp.eq.f32.partialorder %v506_v11, 0.0 }
 0x14a   : > { %v3370_v12 = vpop.eup %3369 }
 0x14b   : > { %v508_v13 = vmul.f32 %v3370_v12, %v506_v11 }
 0x14d   : > { %v510_v15 = vsel %vm509_vm2, %v506_v11, %v508_v13 }
 0x14e   : > { %v513_v16 = vsel %vm511_vm3, %v512_v14, %v510_v15 }
 0x14f   : > { %v514_v17 = vadd.f32 1e-06, %v513_v16 }
 0x151   : > { %3371 = vrcp.f32 %v514_v17 }
 0x15e   : > { %v3372_v20 = vpop.eup %3371 }
 0x15f   : > { %v523_v22 = vmul.f32 %v3372_v20, %v522_v19 }
 0x161   : > { %v530_v23 = vadd.f32 %v2941_v21, %v523_v22 }
 0x163   : > { %v531_v24 = vpack.c.bf16 %v530_v23, %v530_v23 }
 0x165   : > { %3122 = vmatmul.mubr.msk.bf16.vlgmr.msra.gmra.mxu0 %vm494_vm0, %v531_v24 }
 0x166   : > { %3142 = vmatprep.mubr.msk.f32.mxu0 %vm3484_vm1, %v3483_v8 }
 0x225   : > { %v592_v26 = vpop.f32.mrf.mxu0 }
 0x226   : > { %v3662_v27 = vadd.f32 %v2942_v25, %v592_v26 }
 0x227   : > { %v3123_v28 = vpop.f32.mrf.mxu0 }
 0x228   : > { %687 = vrot.lane.b32.xlu0 %v3662_v27, %s4042_s23  ;;  %599 = vrot.lane.b32.xlu1 %v3662_v27, %s4047_s25  ;;  %s4046_s23 = smov 112   ;;  %s4050_s25 = smov 104  }
 0x229   : > { %v595_v29 = vpop.f32.mrf.mxu0 }
 0x22b   : > { %v3124_v30 = vpop.f32.mrf.mxu0 }
 0x29a   : > { %v600_v31 = vpop.permute.xlu1 %599  ;;  %v688_v32 = vpop.permute.xlu0 %687 }
 0x29b   : > { %3126 = vmatpush3.xpose.msk.msra.mxu1 %vm601_vm4, %v600_v31  ;;  %v2958_v31 = vld [vmem:[%s4064_s3 + $0x8] sm:$0xf] }
 0x29c   : > { %3130 = vmatprep.subr.mxu1 %v3483_v8 }
 0x29e   : > { %3128 = vmatmul.mubr.msk.f32.vlgmr.msra.gmra.mxu1 %vm601_vm4, %v3662_v27 }
 0x29f   : > { %3131 = vmatpush3.msra.mxu1 %v688_v32  ;;  %3132 = vmatprep.mubr.msk.f32.mxu1 %vm3484_vm1, %v3483_v8  ;;  %v1198_v32 = vsel %vm936_vm5, %v2958_v31, 0  ;;  %v2968_v31 = vld [vmem:[%s4034_s8] ss:$0 sm:$0xff] }
 0x2a0   : > { %3135 = vmatprep.subr.mxu1 %v3483_v8 }
 0x35e   : > { %v672_v33 = vpop.f32.mrf.mxu1 }
 0x35f   : > { %v676_v34 = vsel %vm601_vm4, %v672_v33, -inf }
 0x360   : > { %677 = vmax.xlane.f32.xlu1 %v676_v34  ;;  %v3129_v35 = vpop.f32.mrf.mxu1 }
 0x3e9   : > { %v678_v36 = vpop.xlane.xlu1 %677 }
 0x3ea   : > { %v679_v37 = vsub.f32 %v672_v33, %v678_v36 }
 0x3ec   : > { %v680_v38 = vmul.f32 1.442695, %v679_v37 }
 0x3ee   : > { %3373 = vpow2.f32 %v680_v38 }
 0x3fb   : > { %v3374_v39 = vpop.eup %3373 }
 0x3fc   : > { %v682_v40 = vsel %vm601_vm4, %v3374_v39, 0.0 }
 0x3fd   : > { %683 = vadd.xlane.f32.xlu0 %v682_v40 }
 0x413   : > { %767 = vrot.lane.b32.xlu0 %v3662_v27, %s4052_s26  ;;  %s4068_s26 = smov 120  }
 0x417   : > { %765 = vrot.lane.b32.xlu0 %v3662_v27, %s4045_s30  ;;  %s4048_s30 = smov 40  }
 0x486   : > { %v684_v41 = vpop.xlane.xlu0 %683 }
 0x487   : > { %3375 = vrcp.f32 %v684_v41 }
 0x48a   : > { %v768_v43 = vpop.permute.xlu0 %767 }
 0x48e   : > { %v766_v45 = vpop.permute.xlu0 %765 }
 0x494   : > { %v3376_v42 = vpop.eup %3375 }
 0x495   : > { %v686_v44 = vmul.f32 %v3376_v42, %v3374_v39 }
 0x497   : > { %3133 = vmatmul.mubr.msk.f32.vlgmr.msra.gmra.mxu1 %vm601_vm4, %v686_v44 }
 0x498   : > { %3136 = vmatpush3.xpose.msk.msra.mxu1 %vm601_vm4, %v768_v43  ;;  %3137 = vmatprep.mubr.msk.f32.mxu1 %vm3484_vm1, %v3483_v8 }
 0x499   : > { %3145 = vmatprep.subr.bf16.mxu1 %v3483_v8 }
 0x49b   : > { %3138 = vmatmul.mubr.msk.f32.vlgmr.msra.gmra.mxu1 %vm601_vm4, %v766_v45 }
 0x49c   : > { %3147 = vmatprep.mubr.msk.bf16.mxu1 %vm3484_vm1, %v3483_v8  ;;  %3146 = vmatpush3.bf16.msra.mxu1 %v938_v58 }
 0x49d   : > { %3157 = vmatprep.subr.mxu1 %v3483_v8 }
 0x557   : > { %v759_v46 = vpop.f32.mrf.mxu1 }
 0x558   : > { %v763_v1 = vpack.c.bf16 %v759_v46, %v759_v46 }
 0x559   : > { %v3134_v47 = vpop.f32.mrf.mxu1 }
 0x55b   : > { %v839_v48 = vpop.f32.mrf.mxu1 }
 0x55c   : > { %v843_v49 = vsel %vm601_vm4, %v839_v48, -inf }
 0x55d   : > { %844 = vmax.xlane.f32.xlu1 %v843_v49  ;;  %v3139_v50 = vpop.f32.mrf.mxu1 }
 0x56e   : > { %854 = vrot.lane.b32.xlu1 %v3662_v27, %s4043_s16  ;;  %s4051_s16 = smov 48  }
 0x572   : > { %1028 = vrot.lane.b32.xlu1 %v3662_v27, %s4044_s17  ;;  %s3044_s17 = sshll.u32 %s3598_s22, 7 }
 0x576   : > { %1026 = vrot.lane.b32.xlu1 %v3662_v27, %s4046_s23  ;;  %s4049_s23 = smov 72  }
 0x5e6   : > { %v845_v51 = vpop.xlane.xlu1 %844 }
 0x5e7   : > { %v846_v52 = vsub.f32 %v839_v48, %v845_v51 }
 0x5e9   : > { %v847_v53 = vmul.f32 1.442695, %v846_v52 }
 0x5ea   : > { %v855_v54 = vpop.permute.xlu1 %854 }
 0x5eb   : > { %3377 = vpow2.f32 %v847_v53  ;;  %3141 = vmatpush3.msra.mxu0 %v855_v54  ;;  %v2963_v53 = vld [vmem:[%s4064_s3 + $0xc] sm:$0xf] }
 0x5ec   : > { %3151 = vmatprep.subr.bf16.mxu0 %v3483_v8  ;;  %v1413_v54 = vsel %vm936_vm5, %v2963_v53, 0 }
 0x5ee   : > { %v1029_v6 = vpop.permute.xlu1 %1028 }
 0x5f2   : > { %v1027_v11 = vpop.permute.xlu1 %1026 }
 0x5f8   : > { %v3378_v55 = vpop.eup %3377 }
 0x5f9   : > { %v849_v56 = vsel %vm601_vm4, %v3378_v55, 0.0 }
 0x5fa   : > { %850 = vadd.xlane.f32.xlu0 %v849_v56 }
 0x610   : > { %1115 = vrot.lane.b32.xlu0 %v3662_v27, %s4051_s16  ;;  %s4071_s16 = smov 112  }
 0x683   : > { %v851_v59 = vpop.xlane.xlu0 %850 }
 0x684   : > { %3379 = vrcp.f32 %v851_v59 }
 0x687   : > { %v1116_v2 = vpop.permute.xlu0 %1115 }
 0x691   : > { %v3380_v61 = vpop.eup %3379 }
 0x692   : > { %v853_v62 = vmul.f32 %v3380_v61, %v3378_v55 }
 0x694   : > { %3143 = vmatmul.mubr.msk.f32.vlgmr.msra.gmra.mxu0 %vm601_vm4, %v853_v62 }
 0x695   : > { %3152 = vmatpush3.bf16.msra.mxu0 %v984_v63  ;;  %3153 = vmatprep.mubr.msk.bf16.mxu0 %vm3484_vm1, %v3483_v8 }
 0x696   : > { %3162 = vmatprep.subr.mxu0 %v3483_v8 }
 0x698   : > { %3154 = vmatmul.mubr.msk.bf16.vlgmr.msra.gmra.mxu0 %vm601_vm4, %v763_v1 }
 0x699   : > { %3163 = vmatpush3.msra.mxu0 %v1116_v2  ;;  %3164 = vmatprep.mubr.msk.f32.mxu0 %vm3484_vm1, %v3483_v8 }
 0x69a   : > { %3173 = vmatprep.subr.mxu0 %v3483_v8 }
 0x754   : > { %v926_v3 = vpop.f32.mrf.mxu0 }
 0x755   : > { %v930_v4 = vpack.c.bf16 %v926_v3, %v926_v3 }
 0x756   : > { %v3144_v5 = vpop.f32.mrf.mxu0 }
 0x757   : > { %3148 = vmatmul.mubr.msk.bf16.vlgmr.msra.gmra.mxu1 %vm601_vm4, %v930_v4 }
 0x758   : > { %3158 = vmatpush3.xpose.msk.msra.mxu1 %vm601_vm4, %v1029_v6  ;;  %v3719_v7 = vpop.f32.mrf.mxu0  ;;  %3159 = vmatprep.mubr.msk.f32.mxu1 %vm3484_vm1, %v3483_v8 }
 0x759   : > { %3167 = vmatprep.subr.bf16.mxu1 %v3483_v8 }
 0x75a   : > { %v3155_v9 = vpop.f32.mrf.mxu0 }
 0x75c   : > { %v1023_v10 = vpop.f32.mrf.mxu0 }
 0x75d   : > { %v3355_v10 = vld [vmem:[%s4033_s7 + $0x8] sm:$0xff]  }
 0x75e   : > { %v3156_v12 = vpop.f32.mrf.mxu0 }
 0x75f   : > { %3160 = vmatmul.mubr.msk.f32.vlgmr.msra.gmra.mxu1 %vm601_vm4, %v1027_v11  ;;  %v3357_v11 = vld [vmem:[%s4035_s9 + $0x18] sm:$0xff]   ;;  %v3358_v12 = vld [vmem:[%s4035_s9 + $0x10] sm:$0xff]  }
 0x760   : > { %3169 = vmatprep.mubr.msk.bf16.mxu1 %vm3484_vm1, %v3483_v8  ;;  %3168 = vmatpush3.bf16.msra.mxu1 %v1198_v32 }
 0x761   : > { %3183 = vmatprep.subr.bf16.mxu1 %v3483_v8 }
 0x817   : > { %v974_v13 = vpop.f32.mrf.mxu1 }
 0x818   : > { %v1021_v45 = vadd.f32 %v3719_v7, %v974_v13 }
 0x819   : > { %v3149_v14 = vpop.f32.mrf.mxu1 }
 0x81b   : > { %v977_v15 = vpop.f32.mrf.mxu1 }
 0x81d   : > { %v3150_v16 = vpop.f32.mrf.mxu1 }
 0x81f   : > { %v1100_v17 = vpop.f32.mrf.mxu1 }
 0x820   : > { %v1104_v18 = vsel %vm601_vm4, %v1100_v17, -inf }
 0x821   : > { %1105 = vmax.xlane.f32.xlu1 %v1104_v18  ;;  %v3161_v19 = vpop.f32.mrf.mxu1 }
 0x8aa   : > { %v1106_v20 = vpop.xlane.xlu1 %1105 }
 0x8ab   : > { %v1107_v21 = vsub.f32 %v1100_v17, %v1106_v20 }
 0x8ad   : > { %v1108_v22 = vmul.f32 1.442695, %v1107_v21  ;;  %v2966_v21 = vld [vmem:[%s4037_s11] ss:$0 sm:$0xff] }
 0x8af   : > { %3381 = vpow2.f32 %v1108_v22 }
 0x8bc   : > { %v3382_v23 = vpop.eup %3381 }
 0x8bd   : > { %v1110_v24 = vsel %vm601_vm4, %v3382_v23, 0.0 }
 0x8be   : > { %1111 = vadd.xlane.f32.xlu0 %v1110_v24  ;;  %v2967_v24 = vld [vmem:[%s4038_s12] ss:$0 sm:$0xff] }
 0x8d4   : > { %1243 = vrot.lane.b32.xlu0 %v3662_v27, %s4049_s23  ;;  %s4066_s23 = smov 88  }
 0x8d8   : > { %1241 = vrot.lane.b32.xlu0 %v3662_v27, %s4050_s25  ;;  %s4067_s25 = smov 96  }
 0x947   : > { %v1112_v25 = vpop.xlane.xlu0 %1111 }
 0x948   : > { %3383 = vrcp.f32 %v1112_v25 }
 0x94b   : > { %v1244_v28 = vpop.permute.xlu0 %1243 }
 0x94f   : > { %v1242_v30 = vpop.permute.xlu0 %1241 }
 0x955   : > { %v3384_v26 = vpop.eup %3383 }
 0x956   : > { %v1114_v29 = vmul.f32 %v3384_v26, %v3382_v23 }
 0x958   : > { %3165 = vmatmul.mubr.msk.f32.vlgmr.msra.gmra.mxu0 %vm601_vm4, %v1114_v29  ;;  %v3359_v29 = vld [vmem:[%s4035_s9 + $0x8] sm:$0xff]  }
 0x959   : > { %3174 = vmatpush3.xpose.msk.msra.mxu0 %vm601_vm4, %v1244_v28  ;;  %3175 = vmatprep.mubr.msk.f32.mxu0 %vm3484_vm1, %v3483_v8 }
 0x95a   : > { %3178 = vmatprep.subr.mxu0 %v3483_v8 }
 0x95c   : > { %3176 = vmatmul.mubr.msk.f32.vlgmr.msra.gmra.mxu0 %vm601_vm4, %v1242_v30  ;;  %v3360_v30 = vld [vmem:[%s4035_s9] sm:$0xff]  }
 0x95d   : > { %3180 = vmatprep.mubr.msk.f32.mxu0 %vm3484_vm1, %v3483_v8 }
 0xa18   : > { %v1187_v33 = vpop.f32.mrf.mxu0 }
 0xa19   : > { %v1191_v34 = vpack.c.bf16 %v1187_v33, %v1187_v33 }
 0xa1a   : > { %v3166_v35 = vpop.f32.mrf.mxu0 }
 0xa1b   : > { %3170 = vmatmul.mubr.msk.bf16.vlgmr.msra.gmra.mxu1 %vm601_vm4, %v1191_v34 }
 0xa1c   : > { %v1315_v36 = vpop.f32.mrf.mxu0  ;;  %3185 = vmatprep.mubr.msk.bf16.mxu1 %vm3484_vm1, %v3483_v8  ;;  %3184 = vmatpush3.bf16.msra.mxu1 %v1413_v54 }
 0xa1d   : > { %v1319_v37 = vsel %vm601_vm4, %v1315_v36, -inf  ;;  %3197 = vmatprep.subr.bf16.mxu1 %v3483_v8 }
 0xa1e   : > { %1320 = vmax.xlane.f32.xlu1 %v1319_v37  ;;  %v3177_v38 = vpop.f32.mrf.mxu0 }
 0xa2f   : > { %1330 = vrot.lane.b32.xlu1 %v3662_v27, %s4048_s30  ;;  %s4072_s30 = smov 64  }
 0xaa7   : > { %v1321_v39 = vpop.xlane.xlu1 %1320 }
 0xaa8   : > { %v1322_v40 = vsub.f32 %v1315_v36, %v1321_v39 }
 0xaaa   : > { %v1323_v41 = vmul.f32 1.442695, %v1322_v40  ;;  %v2977_v40 = vld [vmem:[%s4036_s10] ss:$0 sm:$0xff] }
 0xaab   : > { %v1331_v42 = vpop.permute.xlu1 %1330 }
 0xaac   : > { %3385 = vpow2.f32 %v1323_v41  ;;  %3179 = vmatpush3.msra.mxu0 %v1331_v42 }
 0xaad   : > { %3189 = vmatprep.subr.bf16.mxu0 %v3483_v8 }
 0xab9   : > { %v3386_v43 = vpop.eup %3385 }
 0xaba   : > { %v1325_v44 = vsel %vm601_vm4, %v3386_v43, 0.0 }
 0xabb   : > { %1326 = vadd.xlane.f32.xlu0 %v1325_v44 }
 0xadb   : > { %v1234_v46 = vpop.f32.mrf.mxu1 }
 0xadc   : > { %v1240_v47 = vadd.f32 %v1234_v46, %v1021_v45 }
 0xadd   : > { %v3171_v48 = vpop.f32.mrf.mxu1 }
 0xadf   : > { %v1237_v49 = vpop.f32.mrf.mxu1 }
 0xae1   : > { %v3172_v50 = vpop.f32.mrf.mxu1 }
 0xb44   : > { %v1327_v27 = vpop.xlane.xlu0 %1326 }
 0xb45   : > { %3387 = vrcp.f32 %v1327_v27 }
 0xb52   : > { %v3388_v51 = vpop.eup %3387 }
 0xb53   : > { %v1329_v52 = vmul.f32 %v3388_v51, %v3386_v43  ;;  %v3361_v51 = vld [vmem:[%s4062_s1 + $0x18] sm:$0xff]  }
 0xb55   : > { %3181 = vmatmul.mubr.msk.f32.vlgmr.msra.gmra.mxu0 %vm601_vm4, %v1329_v52  ;;  %v3362_v52 = vld [vmem:[%s4062_s1 + $0x10] sm:$0xff]  }
 0xb56   : > { %3193 = vmatprep.mubr.msk.bf16.mxu0 %vm3484_vm1, %v3483_v8  ;;  %3190 = vmatpush3.bf16.msra.mxu0 %v3355_v10 }
 0xb57   : > { %3191 = vmatprep.subr.bf16.mxu0 %v3483_v8 }
 0xc15   : > { %v1402_v55 = vpop.f32.mrf.mxu0 }
 0xc16   : > { %v1406_v56 = vpack.c.bf16 %v1402_v55, %v1402_v55 }
 0xc17   : > { %v3182_v57 = vpop.f32.mrf.mxu0 }
 0xc18   : > { %3186 = vmatmul.mubr.msk.bf16.vlgmr.msra.gmra.mxu1 %vm601_vm4, %v1406_v56 }
 0xc19   : > { %3205 = vmatprep.mubr.msk.bf16.mxu1 %vm3484_vm1, %v3483_v8  ;;  %3198 = vmatpush3.bf16.msra.mxu1 %v3357_v11 }
 0xc1a   : > { %3199 = vmatprep.subr.bf16.mxu1 %v3483_v8 }
 0xc1d   : > { %3200 = vmatpush3.bf16.msra.mxu1 %v3358_v12 }
 0xc1e   : > { %3201 = vmatprep.subr.bf16.mxu1 %v3483_v8 }
 0xc21   : > { %3202 = vmatpush3.bf16.msra.mxu1 %v3359_v29 }
 0xc22   : > { %3203 = vmatprep.subr.bf16.mxu1 %v3483_v8 }
 0xc25   : > { %3204 = vmatpush3.bf16.msra.mxu1 %v3360_v30 }
 0xc26   : > { %3222 = vmatprep.subr.mxu1 %v3483_v8 }
 0xcd8   : > { %v1449_v58 = vpop.f32.mrf.mxu1 }
 0xcd9   : > { %v1455_v59 = vadd.f32 %v1449_v58, %v1240_v47 }
 0xcda   : > { %v3187_v61 = vpop.f32.mrf.mxu1 }
 0xcdb   : > { %v1456_v62 = vadd.f32 %v1455_v59, %v3630_v0  ;;  %v3356_v0 = vld [vmem:[%s4033_s7] sm:$0xff]  }
 0xcdc   : > { %v1452_v63 = vpop.f32.mrf.mxu1  ;;  %3192 = vmatpush3.bf16.msra.mxu0 %v3356_v0  ;;  %v2980_v61 = vld [vmem:[%s4031_s5 + $0x1] ss:$0 sm:$0xff] }
 0xcdd   : > { %v1464_v1 = vadd.f32 %v2965_v60, %v1456_v62  ;;  %3209 = vmatprep.subr.bf16.mxu0 %v3483_v8 }
 0xcde   : > { %v3188_v2 = vpop.f32.mrf.mxu1 }
 0xcdf   : > { %v1467_v3 = vsel %vm494_vm0, %v1464_v1, 0.0 }
 0xce0   : > { %1468 = vadd.xlane.f32.xlu1 %v1467_v3 }
 0xd69   : > { %v1469_v4 = vpop.xlane.xlu1 %1468 }
 0xd6a   : > { %v1470_v5 = vmul.f32 0.03125, %v1469_v4 }
 0xd6c   : > { %v1471_v6 = vsub.f32 %v1464_v1, %v1470_v5  ;;  %v2987_v5 = vld [vmem:[%s4063_s2 + $0x1] ss:$0 sm:$0xff] }
 0xd6e   : > { %v1472_v7 = vmul.f32 %v1471_v6, %v1471_v6  ;;  %v1492_v22 = vmul.f32 %v2966_v21, %v1471_v6 }
 0xd70   : > { %v1473_v9 = vsel %vm494_vm0, %v1472_v7, 0.0 }
 0xd71   : > { %1474 = vadd.xlane.f32.xlu0 %v1473_v9 }
 0xdfa   : > { %v1475_v13 = vpop.xlane.xlu0 %1474 }
 0xdfb   : > { %v1476_v14 = vmul.f32 0.032258064, %v1475_v13 }
 0xdfd   : > { %3389 = vrsqrt.f32 %v1476_v14  ;;  %vm1479_vm6 = vcmp.eq.f32.partialorder %v1476_v14, inf  ;;  %v1482_v17 = vand.u32 2147483648, %v1476_v14  ;;  %vm1481_vm7 = vcmp.eq.f32.partialorder %v1476_v14, 0.0 }
 0xe0a   : > { %v3390_v15 = vpop.eup %3389 }
 0xe0b   : > { %v1478_v16 = vmul.f32 %v3390_v15, %v1476_v14 }
 0xe0d   : > { %v1480_v18 = vsel %vm1479_vm6, %v1476_v14, %v1478_v16 }
 0xe0e   : > { %v1483_v19 = vsel %vm1481_vm7, %v1482_v17, %v1480_v18 }
 0xe0f   : > { %v1484_v20 = vadd.f32 1e-06, %v1483_v19 }
 0xe11   : > { %3391 = vrcp.f32 %v1484_v20 }
 0xe1e   : > { %v3392_v23 = vpop.eup %3391 }
 0xe1f   : > { %v1493_v25 = vmul.f32 %v3392_v23, %v1492_v22 }
 0xe21   : > { %v1500_v26 = vadd.f32 %v2967_v24, %v1493_v25 }
 0xe23   : > { %v1501_v28 = vpack.c.bf16 %v1500_v26, %v1500_v26 }
 0xe25   : > { %3194 = vmatmul.mubr.msk.bf16.vlgmr.msra.gmra.mxu0 %vm494_vm0, %v1501_v28 }
 0xe26   : > { %3213 = vmatprep.mubr.msk.bf16.mxu0 %vm3484_vm1, %v3483_v8  ;;  %3210 = vmatpush3.bf16.msra.mxu0 %v3361_v51 }
 0xe27   : > { %3211 = vmatprep.subr.bf16.mxu0 %v3483_v8 }
 0xe2a   : > { %3212 = vmatpush3.bf16.msra.mxu0 %v3362_v52 }
 0xe2b   : > { %3217 = vmatprep.subr.mxu0 %v3483_v8 }
 0xee5   : > { %v1562_v32 = vpop.f32.mrf.mxu0 }
 0xee6   : > { %v1563_v33 = vadd.f32 %v2968_v31, %v1562_v32 }
 0xee7   : > { %v3195_v34 = vpop.f32.mrf.mxu0 }
 0xee8   : > { %v1568_v35 = vmax.f32 %v1563_v33, 0.0 }
 0xee9   : > { %v1565_v36 = vpop.f32.mrf.mxu0 }
 0xeea   : > { %v1569_v37 = vpack.c.bf16 %v1568_v35, %v1568_v35 }
 0xeeb   : > { %v3196_v38 = vpop.f32.mrf.mxu0 }
 0xeec   : > { %3206 = vmatmul.mubr.msk.bf16.vlgmr.msra.gmra.mxu1 %vm1602_vm8, %v1569_v37 }
 0xeed   : > { %3224 = vmatprep.mubr.msk.f32.mxu1 %vm3484_vm1, %v3483_v8 }
 0xfac   : > { %v1640_v39 = vpop.f32.mrf.mxu1 }
 0xfad   : > { %v1646_v41 = vadd.f32 %v1640_v39, %v1464_v1  ;;  %v2981_v1 = vld [vmem:[%s4032_s6 + $0x1] ss:$0 sm:$0xff]  ;;  %v2994_v39 = vld [vmem:[%s4064_s3 + $0x10] sm:$0xf] }
 0xfae   : > { %v3207_v42 = vpop.f32.mrf.mxu1 }
 0xfaf   : > { %v3814_v43 = vadd.f32 %v2977_v40, %v1646_v41  ;;  %v2147_v40 = vsel %vm936_vm5, %v2994_v39, 0  ;;  %v2998_v41 = vld [vmem:[%s4064_s3 + $0x14] sm:$0xf] }
 0xfb0   : > { %v1643_v44 = vpop.f32.mrf.mxu1  ;;  %v2101_v42 = vsel %vm936_vm5, %v2998_v41, 0  ;;  %v3012_v41 = vld [vmem:[%s4065_s4 + $0x1] ss:$0 sm:$0xff]  ;;  %s2873_s4 = scalar_lea.hbm %s4041_s15, %s3044_s17 }
 0xfb1   : > { %v1659_v45 = vsel %vm494_vm0, %v3814_v43, 0.0 }
 0xfb2   : > { %1660 = vadd.xlane.f32.xlu0 %v1659_v45  ;;  %v3208_v46 = vpop.f32.mrf.mxu1 }
0x103b   : > { %v1661_v47 = vpop.xlane.xlu0 %1660 }
0x103c   : > { %v1662_v48 = vmul.f32 0.03125, %v1661_v47 }
0x103e   : > { %v1663_v49 = vsub.f32 %v3814_v43, %v1662_v48 }
0x1040   : > { %v1664_v50 = vmul.f32 %v1663_v49, %v1663_v49  ;;  %v1684_v62 = vmul.f32 %v2980_v61, %v1663_v49 }
0x1042   : > { %v1665_v27 = vsel %vm494_vm0, %v1664_v50, 0.0 }
0x1043   : > { %1666 = vadd.xlane.f32.xlu0 %v1665_v27 }
0x10cc   : > { %v1667_v53 = vpop.xlane.xlu0 %1666 }
0x10cd   : > { %v1668_v54 = vmul.f32 0.032258064, %v1667_v53 }
0x10cf   : > { %3393 = vrsqrt.f32 %v1668_v54  ;;  %vm1671_vm9 = vcmp.eq.f32.partialorder %v1668_v54, inf  ;;  %v1674_v57 = vand.u32 2147483648, %v1668_v54  ;;  %vm1673_vm10 = vcmp.eq.f32.partialorder %v1668_v54, 0.0 }
0x10dc   : > { %v3394_v55 = vpop.eup %3393 }
0x10dd   : > { %v1670_v56 = vmul.f32 %v3394_v55, %v1668_v54 }
0x10df   : > { %v1672_v58 = vsel %vm1671_vm9, %v1668_v54, %v1670_v56 }
0x10e0   : > { %v1675_v59 = vsel %vm1673_vm10, %v1674_v57, %v1672_v58 }
0x10e1   : > { %v1676_v60 = vadd.f32 1e-06, %v1675_v59 }
0x10e3   : > { %3395 = vrcp.f32 %v1676_v60 }
0x10f0   : > { %v3396_v63 = vpop.eup %3395 }
0x10f1   : > { %v1685_v2 = vmul.f32 %v3396_v63, %v1684_v62 }
0x10f3   : > { %v1692_v3 = vadd.f32 %v2981_v1, %v1685_v2 }
0x10f5   : > { %v1693_v4 = vpack.c.bf16 %v1692_v3, %v1692_v3 }
0x10f7   : > { %3214 = vmatmul.mubr.msk.bf16.vlgmr.msra.gmra.mxu0 %vm494_vm0, %v1693_v4 }
0x10f8   : > { %3219 = vmatprep.mubr.msk.f32.mxu0 %vm3484_vm1, %v3483_v8 }
0x11b7   : > { %v1756_v6 = vpop.f32.mrf.mxu0 }
0x11b8   : > { %v3840_v7 = vadd.f32 %v2987_v5, %v1756_v6 }
0x11b9   : > { %v3215_v9 = vpop.f32.mrf.mxu0 }
0x11ba   : > { %1931 = vrot.lane.b32.xlu1 %v3840_v7, %s4066_s23  ;;  %1763 = vrot.lane.b32.xlu0 %v3840_v7, %s4067_s25  ;;  %s4076_s23 = smov 40   ;;  %s483_s25 = sand.u32 1, %s3473_s19  }
0x11bb   : > { %v1759_v10 = vpop.f32.mrf.mxu0 }
0x11bd   : > { %v3216_v0 = vpop.f32.mrf.mxu0 }
0x11be   : > { %1929 = vrot.lane.b32.xlu0 %v3840_v7, %s4068_s26  ;;  %s2938_s26 = sshll.u32 %s483_s25, 3 }
0x122c   : > { %v1764_v11 = vpop.permute.xlu0 %1763  ;;  %v1932_v12 = vpop.permute.xlu1 %1931 }
0x122d   : > { %3218 = vmatpush3.xpose.msk.msra.mxu0 %vm601_vm4, %v1764_v11 }
0x122e   : > { %3227 = vmatprep.subr.mxu0 %v3483_v8 }
0x1230   : > { %3220 = vmatmul.mubr.msk.f32.vlgmr.msra.gmra.mxu0 %vm601_vm4, %v3840_v7  ;;  %v1930_v13 = vpop.permute.xlu0 %1929 }
0x1231   : > { %3228 = vmatpush3.xpose.msk.msra.mxu0 %vm601_vm4, %v1932_v12  ;;  %3229 = vmatprep.mubr.msk.f32.mxu0 %vm3484_vm1, %v3483_v8  ;;  %v3004_v12 = vld [vmem:[%s4064_s3 + $0x18] sm:$0xf] }
0x1232   : > { %3237 = vmatprep.subr.bf16.mxu0 %v3483_v8 }
0x1234   : > { %3230 = vmatmul.mubr.msk.f32.vlgmr.msra.gmra.mxu0 %vm601_vm4, %v1930_v13  ;;  %v2361_v13 = vsel %vm936_vm5, %v3004_v12, 0 }
0x1235   : > { %3239 = vmatprep.mubr.msk.bf16.mxu0 %vm3484_vm1, %v3483_v8  ;;  %3238 = vmatpush3.bf16.msra.mxu0 %v2101_v42 }
0x1236   : > { %3249 = vmatprep.subr.mxu0 %v3483_v8 }
0x12f0   : > { %v1835_v14 = vpop.f32.mrf.mxu0 }
0x12f1   : > { %v1839_v15 = vsel %vm601_vm4, %v1835_v14, -inf }
0x12f2   : > { %1840 = vmax.xlane.f32.xlu0 %v1839_v15  ;;  %v3221_v16 = vpop.f32.mrf.mxu0 }
0x12f4   : > { %v2003_v17 = vpop.f32.mrf.mxu0 }
0x12f5   : > { %v2007_v18 = vsel %vm601_vm4, %v2003_v17, -inf }
0x12f6   : > { %2008 = vmax.xlane.f32.xlu1 %v2007_v18  ;;  %v3231_v19 = vpop.f32.mrf.mxu0 }
0x1307   : > { %2018 = vrot.lane.b32.xlu1 %v3840_v7, %s4069_s0  ;;  %s4073_s0 = smov 48  }
0x130b   : > { %2191 = vrot.lane.b32.xlu1 %v3840_v7, %s4070_s27  ;;  %s4074_s27 = smov 104  }
0x130f   : > { %2189 = vrot.lane.b32.xlu1 %v3840_v7, %s4071_s16  ;;  %s4075_s16 = smov 72  }
0x137b   : > { %v1841_v20 = vpop.xlane.xlu0 %1840 }
0x137c   : > { %v1842_v21 = vsub.f32 %v1835_v14, %v1841_v20 }
0x137e   : > { %v1843_v22 = vmul.f32 1.442695, %v1842_v21 }
0x137f   : > { %v2009_v23 = vpop.xlane.xlu1 %2008 }
0x1380   : > { %3397 = vpow2.f32 %v1843_v22  ;;  %v2010_v24 = vsub.f32 %v2003_v17, %v2009_v23 }
0x1382   : > { %v2011_v25 = vmul.f32 1.442695, %v2010_v24 }
0x1383   : > { %v2019_v36 = vpop.permute.xlu1 %2018 }
0x1384   : > { %3399 = vpow2.f32 %v2011_v25 }
0x1387   : > { %v2192_v50 = vpop.permute.xlu1 %2191 }
0x138b   : > { %v2190_v27 = vpop.permute.xlu1 %2189 }
0x138d   : > { %v3398_v26 = vpop.eup %3397 }
0x138e   : > { %v1845_v28 = vsel %vm601_vm4, %v3398_v26, 0.0 }
0x138f   : > { %1846 = vadd.xlane.f32.xlu0 %v1845_v28 }
0x1391   : > { %v3400_v29 = vpop.eup %3399 }
0x1392   : > { %v2013_v30 = vsel %vm601_vm4, %v3400_v29, 0.0 }
0x1393   : > { %2014 = vadd.xlane.f32.xlu0 %v2013_v30 }
0x13a9   : > { %1850 = vrot.lane.b32.xlu0 %v3840_v7, %s4072_s30 }
0x1418   : > { %v1847_v31 = vpop.xlane.xlu0 %1846 }
0x1419   : > { %3401 = vrcp.f32 %v1847_v31 }
0x141c   : > { %v2015_v32 = vpop.xlane.xlu0 %2014 }
0x141d   : > { %3403 = vrcp.f32 %v2015_v32 }
0x1420   : > { %v1851_v33 = vpop.permute.xlu0 %1850 }
0x1421   : > { %3223 = vmatpush3.msra.mxu1 %v1851_v33 }
0x1422   : > { %3232 = vmatprep.subr.mxu1 %v3483_v8 }
0x1426   : > { %v3402_v34 = vpop.eup %3401 }
0x1427   : > { %v1849_v35 = vmul.f32 %v3402_v34, %v3398_v26 }
0x1429   : > { %3225 = vmatmul.mubr.msk.f32.vlgmr.msra.gmra.mxu1 %vm601_vm4, %v1849_v35 }
0x142a   : > { %v3404_v37 = vpop.eup %3403  ;;  %3233 = vmatpush3.msra.mxu1 %v2019_v36  ;;  %3234 = vmatprep.mubr.msk.f32.mxu1 %vm3484_vm1, %v3483_v8 }
0x142b   : > { %v2017_v38 = vmul.f32 %v3404_v37, %v3400_v29  ;;  %3243 = vmatprep.subr.bf16.mxu1 %v3483_v8 }
0x142d   : > { %3235 = vmatmul.mubr.msk.f32.vlgmr.msra.gmra.mxu1 %vm601_vm4, %v2017_v38 }
0x142e   : > { %3245 = vmatprep.mubr.msk.bf16.mxu1 %vm3484_vm1, %v3483_v8  ;;  %3244 = vmatpush3.bf16.msra.mxu1 %v2147_v40 }
0x142f   : > { %3254 = vmatprep.subr.mxu1 %v3483_v8 }
0x14e9   : > { %v1922_v44 = vpop.f32.mrf.mxu1 }
0x14ea   : > { %v1926_v45 = vpack.c.bf16 %v1922_v44, %v1922_v44 }
0x14eb   : > { %v3226_v46 = vpop.f32.mrf.mxu1 }
0x14ec   : > { %3246 = vmatmul.mubr.msk.bf16.vlgmr.msra.gmra.mxu1 %vm601_vm4, %v1926_v45 }
0x14ed   : > { %v2090_v47 = vpop.f32.mrf.mxu1  ;;  %3256 = vmatprep.mubr.msk.f32.mxu1 %vm3484_vm1, %v3483_v8 }
0x14ee   : > { %v2094_v48 = vpack.c.bf16 %v2090_v47, %v2090_v47 }
0x14ef   : > { %v3236_v49 = vpop.f32.mrf.mxu1 }
0x14f0   : > { %3240 = vmatmul.mubr.msk.bf16.vlgmr.msra.gmra.mxu0 %vm601_vm4, %v2094_v48 }
0x14f1   : > { %3250 = vmatpush3.xpose.msk.msra.mxu0 %vm601_vm4, %v2192_v50  ;;  %3251 = vmatprep.mubr.msk.f32.mxu0 %vm3484_vm1, %v3483_v8 }
0x14f2   : > { %3259 = vmatprep.subr.bf16.mxu0 %v3483_v8 }
0x14f8   : > { %3252 = vmatmul.mubr.msk.f32.vlgmr.msra.gmra.mxu0 %vm601_vm4, %v2190_v27 }
0x14f9   : > { %3261 = vmatprep.mubr.msk.bf16.mxu0 %vm3484_vm1, %v3483_v8  ;;  %3260 = vmatpush3.bf16.msra.mxu0 %v2361_v13 }
0x14fa   : > { %3289 = vmatprep.subr.bf16.mxu0 %v3483_v8 }
0x15ac   : > { %v2183_v51 = vpop.f32.mrf.mxu1 }
0x15ae   : > { %v3247_v52 = vpop.f32.mrf.mxu1 }
0x15b0   : > { %v2137_v53 = vpop.f32.mrf.mxu0  ;;  %v2186_v54 = vpop.f32.mrf.mxu1 }
0x15b1   : > { %v2184_v55 = vadd.f32 %v2183_v51, %v2137_v53  ;;  %v3363_v53 = vld [vmem:[%s4033_s7 + $0x18] sm:$0xff]  }
0x15b2   : > { %v3241_v56 = vpop.f32.mrf.mxu0  ;;  %v3248_v57 = vpop.f32.mrf.mxu1  ;;  %v3365_v54 = vld [vmem:[%s4035_s9 + $0x38] sm:$0xff]  }
0x15b4   : > { %v2140_v58 = vpop.f32.mrf.mxu0 }
0x15b6   : > { %v3242_v59 = vpop.f32.mrf.mxu0 }
0x15b8   : > { %v2263_v60 = vpop.f32.mrf.mxu0 }
0x15b9   : > { %v2267_v61 = vsel %vm601_vm4, %v2263_v60, -inf }
0x15ba   : > { %2268 = vmax.xlane.f32.xlu0 %v2267_v61  ;;  %v3253_v62 = vpop.f32.mrf.mxu0 }
0x15d0   : > { %2278 = vrot.lane.b32.xlu0 %v3840_v7, %s4073_s0  ;;  %s2862_s0 = scalar_lea.sflag [#allocation3], %s483_s25 }
0x15d4   : > { %2404 = vrot.lane.b32.xlu0 %v3840_v7, %s4074_s27 }
0x1643   : > { %v2269_v63 = vpop.xlane.xlu0 %2268 }
0x1644   : > { %v2270_v1 = vsub.f32 %v2263_v60, %v2269_v63 }
0x1646   : > { %v2271_v2 = vmul.f32 1.442695, %v2270_v1  ;;  %v3015_v1 = vld [vmem:[%s4037_s11 + $0x1] ss:$0 sm:$0xff] }
0x1647   : > { %v2279_v3 = vpop.permute.xlu0 %2278 }
0x1648   : > { %3405 = vpow2.f32 %v2271_v2  ;;  %3255 = vmatpush3.msra.mxu1 %v2279_v3 }
0x1649   : > { %3265 = vmatprep.subr.mxu1 %v3483_v8 }
0x164b   : > { %v2405_v11 = vpop.permute.xlu0 %2404 }
0x1655   : > { %v3406_v4 = vpop.eup %3405 }
0x1656   : > { %v2273_v5 = vsel %vm601_vm4, %v3406_v4, 0.0 }
0x1657   : > { %2274 = vadd.xlane.f32.xlu1 %v2273_v5 }
0x1668   : > { %2406 = vrot.lane.b32.xlu1 %v3840_v7, %s4075_s16  ;;  %s3496_s16 = smov [#allocation2]  }
0x1669   : > { %s3425_s30 = sshll.u32 %s3496_s16, 4  ;;  %s3426_s30 = int_to_ptr.vmem [resolvable:$false] %s3425_s30 }
0x166a   : > { %s3427_s22 = scalar_lea.vmem %s3426_s30, 256 }
0x16e0   : > { %v2275_v6 = vpop.xlane.xlu1 %2274 }
0x16e1   : > { %3407 = vrcp.f32 %v2275_v6 }
0x16e4   : > { %v2407_v0 = vpop.permute.xlu1 %2406 }
0x16ee   : > { %v3408_v9 = vpop.eup %3407 }
0x16ef   : > { %v2277_v10 = vmul.f32 %v3408_v9, %v3406_v4  ;;  %v3016_v4 = vld [vmem:[%s4038_s12 + $0x1] ss:$0 sm:$0xff] }
0x16f1   : > { %3257 = vmatmul.mubr.msk.f32.vlgmr.msra.gmra.mxu1 %vm601_vm4, %v2277_v10  ;;  %v3367_v10 = vld [vmem:[%s4035_s9 + $0x28] sm:$0xff]  }
0x16f2   : > { %3266 = vmatpush3.xpose.msk.msra.mxu1 %vm601_vm4, %v2407_v0  ;;  %3267 = vmatprep.mubr.msk.f32.mxu1 %vm3484_vm1, %v3483_v8  ;;  %v3368_v0 = vld [vmem:[%s4035_s9 + $0x20] sm:$0xff]  }
0x16f3   : > { %3270 = vmatprep.subr.mxu1 %v3483_v8 }
0x16f5   : > { %3268 = vmatmul.mubr.msk.f32.vlgmr.msra.gmra.mxu1 %vm601_vm4, %v2405_v11  ;;  %v3022_v11 = vld [vmem:[%s4034_s8 + $0x1] ss:$0 sm:$0xff] }
0x16f6   : > { %3272 = vmatprep.mubr.msk.f32.mxu1 %vm3484_vm1, %v3483_v8 }
0x17b1   : > { %v2350_v14 = vpop.f32.mrf.mxu1 }
0x17b2   : > { %v2354_v15 = vpack.c.bf16 %v2350_v14, %v2350_v14 }
0x17b3   : > { %v3258_v16 = vpop.f32.mrf.mxu1 }
0x17b4   : > { %3262 = vmatmul.mubr.msk.bf16.vlgmr.msra.gmra.mxu0 %vm601_vm4, %v2354_v15 }
0x17b5   : > { %v2478_v17 = vpop.f32.mrf.mxu1  ;;  %3297 = vmatprep.mubr.msk.bf16.mxu0 %vm3484_vm1, %v3483_v8  ;;  %3290 = vmatpush3.bf16.msra.mxu0 %v3365_v54 }
0x17b6   : > { %v2482_v18 = vsel %vm601_vm4, %v2478_v17, -inf  ;;  %3291 = vmatprep.subr.bf16.mxu0 %v3483_v8 }
0x17b7   : > { %2483 = vmax.xlane.f32.xlu1 %v2482_v18  ;;  %v3269_v19 = vpop.f32.mrf.mxu1 }
0x1840   : > { %v2484_v20 = vpop.xlane.xlu1 %2483 }
0x1841   : > { %v2485_v21 = vsub.f32 %v2478_v17, %v2484_v20 }
0x1843   : > { %v2486_v22 = vmul.f32 1.442695, %v2485_v21 }
0x1845   : > { %3409 = vpow2.f32 %v2486_v22 }
0x1852   : > { %v3410_v23 = vpop.eup %3409 }
0x1853   : > { %v2488_v24 = vsel %vm601_vm4, %v3410_v23, 0.0 }
0x1854   : > { %2489 = vadd.xlane.f32.xlu0 %v2488_v24 }
0x186a   : > { %2493 = vrot.lane.b32.xlu0 %v3840_v7, %s4076_s23  ;;  %v3009_v7 = vld [vmem:[%s4064_s3 + $0x1c] sm:$0xf]  ;;  %s485_s23 = scalar_lea.vmem [#allocation2], %s2938_s26 }
0x186b   : > { %v2576_v35 = vsel %vm936_vm5, %v3009_v7, 0  ;;  %s2875_s1 = sshll.u32 %s485_s23, 4  ;;  %s2876_s1 = int_to_ptr.vmem [resolvable:$true] %s2875_s1 }
0x186c   : > { %s3421_s27 = scalar_lea.vmem %s2876_s1, 128  ;;  %p3428_p0 = scmp.lt.s32.totalorder %s2876_s1, %s3426_s30 }
0x186d   : > { %p3422_p11 = scmp.ne.s32.totalorder %s2876_s1, %s3421_s27  ;;  %p3429_p1 = scmp.lt.s32.totalorder %s3427_s22, %s3421_s27 }
0x186f   : > { %p3423_p12 = pnand %p3422_p11, %p3615_p5  ;;  %p3430_p2 = por %p3429_p1, %p3428_p0 }
0x1871   : > { %p3424_p13 = pneg %p3423_p12 }
0x1873   : > { %p3431_p3 = pnand %p3430_p2, %p3424_p13 }
0x1874   : > { %v2397_v25 = vpop.f32.mrf.mxu0 }
0x1875   : > { %v2403_v26 = vadd.f32 %v2397_v25, %v2184_v55  ;;  %v3366_v55 = vld [vmem:[%s4035_s9 + $0x30] sm:$0xff]  }
0x1876   : > { %v3263_v28 = vpop.f32.mrf.mxu0  ;;  %3292 = vmatpush3.bf16.msra.mxu0 %v3366_v55 }
0x1877   : > { %3293 = vmatprep.subr.bf16.mxu0 %v3483_v8 }
0x1878   : > { %v2400_v29 = vpop.f32.mrf.mxu0 }
0x187a   : > { %v3264_v30 = vpop.f32.mrf.mxu0  ;;  %3294 = vmatpush3.bf16.msra.mxu0 %v3367_v10 }
0x187b   : > { %3295 = vmatprep.subr.bf16.mxu0 %v3483_v8 }
0x187e   : > { %3296 = vmatpush3.bf16.msra.mxu0 %v3368_v0 }
0x18dd   : > { %v2490_v31 = vpop.xlane.xlu0 %2489 }
0x18de   : > { %3411 = vrcp.f32 %v2490_v31 }
0x18e1   : > { %v2494_v32 = vpop.permute.xlu0 %2493 }
0x18e2   : > { %3271 = vmatpush3.msra.mxu1 %v2494_v32 }
0x18e3   : > { %3275 = vmatprep.subr.bf16.mxu1 %v3483_v8 }
0x18eb   : > { %v3412_v33 = vpop.eup %3411 }
0x18ec   : > { %v2492_v34 = vmul.f32 %v3412_v33, %v3410_v23 }
0x18ee   : > { %3273 = vmatmul.mubr.msk.f32.vlgmr.msra.gmra.mxu1 %vm601_vm4, %v2492_v34 }
0x18ef   : > { %3277 = vmatprep.mubr.msk.bf16.mxu1 %vm3484_vm1, %v3483_v8  ;;  %3276 = vmatpush3.bf16.msra.mxu1 %v2576_v35 }
0x18f0   : > { %3281 = vmatprep.subr.bf16.mxu1 %v3483_v8 }
0x19ae   : > { %v2565_v36 = vpop.f32.mrf.mxu1 }
0x19af   : > { %v2569_v37 = vpack.c.bf16 %v2565_v36, %v2565_v36 }
0x19b0   : > { %v3274_v38 = vpop.f32.mrf.mxu1 }
0x19b1   : > { %3278 = vmatmul.mubr.msk.bf16.vlgmr.msra.gmra.mxu1 %vm601_vm4, %v2569_v37 }
0x19b2   : > { %3285 = vmatprep.mubr.msk.bf16.mxu1 %vm3484_vm1, %v3483_v8  ;;  %3282 = vmatpush3.bf16.msra.mxu1 %v3363_v53 }
0x19b3   : > { %3283 = vmatprep.subr.bf16.mxu1 %v3483_v8  ;;  %v3040_v8 = vld [vmem:[%s4036_s10 + $0x1] ss:$0 sm:$0xff] }
0x1a71   : > { %v2612_v39 = vpop.f32.mrf.mxu1 }
0x1a72   : > { %v2618_v40 = vadd.f32 %v2612_v39, %v2403_v26  ;;  %v3041_v39 = vld [vmem:[%s4039_s13] ss:$0 sm:$0xff] }
0x1a73   : > { %v3279_v42 = vpop.f32.mrf.mxu1 }
0x1a74   : > { %v2619_v44 = vadd.f32 %v2618_v40, %v3814_v43  ;;  %v3364_v43 = vld [vmem:[%s4033_s7 + $0x10] sm:$0xff]   ;;  %v3042_v42 = vld [vmem:[%s4040_s14] ss:$0 sm:$0xff] }
0x1a75   : > { %v2615_v45 = vpop.f32.mrf.mxu1  ;;  %3284 = vmatpush3.bf16.msra.mxu1 %v3364_v43 }
0x1a76   : > { %v2628_v46 = vadd.f32 %v3012_v41, %v2619_v44 }
0x1a77   : > { %v3280_v47 = vpop.f32.mrf.mxu1 }
0x1a78   : > { %v2633_v48 = vsel %vm494_vm0, %v2628_v46, 0.0 }
0x1a79   : > { %2634 = vadd.xlane.f32.xlu1 %v2633_v48 }
0x1b02   : > { %v2635_v49 = vpop.xlane.xlu1 %2634 }
0x1b03   : > { %v2636_v50 = vmul.f32 0.03125, %v2635_v49 }
0x1b05   : > { %v2637_v27 = vsub.f32 %v2628_v46, %v2636_v50 }
0x1b07   : > { %v2638_v51 = vmul.f32 %v2637_v27, %v2637_v27  ;;  %v2658_v2 = vmul.f32 %v3015_v1, %v2637_v27 }
0x1b09   : > { %v2639_v52 = vsel %vm494_vm0, %v2638_v51, 0.0 }
0x1b0a   : > { %2640 = vadd.xlane.f32.xlu1 %v2639_v52 }
0x1b93   : > { %v2641_v56 = vpop.xlane.xlu1 %2640 }
0x1b94   : > { %v2642_v57 = vmul.f32 0.032258064, %v2641_v56 }
0x1b96   : > { %3413 = vrsqrt.f32 %v2642_v57  ;;  %vm2645_vm11 = vcmp.eq.f32.partialorder %v2642_v57, inf  ;;  %v2648_v60 = vand.u32 2147483648, %v2642_v57  ;;  %vm2647_vm12 = vcmp.eq.f32.partialorder %v2642_v57, 0.0 }
0x1ba3   : > { %v3414_v58 = vpop.eup %3413 }
0x1ba4   : > { %v2644_v59 = vmul.f32 %v3414_v58, %v2642_v57 }
0x1ba6   : > { %v2646_v61 = vsel %vm2645_vm11, %v2642_v57, %v2644_v59 }
0x1ba7   : > { %v2649_v62 = vsel %vm2647_vm12, %v2648_v60, %v2646_v61 }
0x1ba8   : > { %v2650_v63 = vadd.f32 1e-06, %v2649_v62 }
0x1baa   : > { %3415 = vrcp.f32 %v2650_v63 }
0x1bb7   : > { %v3416_v3 = vpop.eup %3415 }
0x1bb8   : > { %v2659_v5 = vmul.f32 %v3416_v3, %v2658_v2 }
0x1bba   : > { %v2666_v6 = vadd.f32 %v3016_v4, %v2659_v5 }
0x1bbc   : > { %v2667_v9 = vpack.c.bf16 %v2666_v6, %v2666_v6 }
0x1bbe   : > { %3286 = vmatmul.mubr.msk.bf16.vlgmr.msra.gmra.mxu1 %vm494_vm0, %v2667_v9 }
0x1c7e   : > { %v2730_v12 = vpop.f32.mrf.mxu1 }
0x1c7f   : > { %v2731_v13 = vadd.f32 %v3022_v11, %v2730_v12 }
0x1c80   : > { %v3287_v14 = vpop.f32.mrf.mxu1 }
0x1c81   : > { %v2736_v15 = vmax.f32 %v2731_v13, 0.0 }
0x1c82   : > { %v2733_v16 = vpop.f32.mrf.mxu1 }
0x1c83   : > { %v2737_v17 = vpack.c.bf16 %v2736_v15, %v2736_v15 }
0x1c84   : > { %v3288_v18 = vpop.f32.mrf.mxu1 }
0x1c85   : > { %3298 = vmatmul.mubr.msk.bf16.vlgmr.msra.gmra.mxu0 %vm1602_vm8, %v2737_v17 }
0x1d45   : > { %v2808_v19 = vpop.f32.mrf.mxu0 }
0x1d46   : > { %v2814_v20 = vadd.f32 %v2808_v19, %v2628_v46 }
0x1d47   : > { %v3299_v21 = vpop.f32.mrf.mxu0 }
0x1d48   : > { %v2823_v22 = vadd.f32 %v3040_v8, %v2814_v20 }
0x1d49   : > { %v2811_v23 = vpop.f32.mrf.mxu0 }
0x1d4a   : > { %v2826_v24 = vsel %vm494_vm0, %v2823_v22, 0.0 }
0x1d4b   : > { %2827 = vadd.xlane.f32.xlu1 %v2826_v24  ;;  %v3300_v25 = vpop.f32.mrf.mxu0 }
0x1dd4   : > { %v2828_v26 = vpop.xlane.xlu1 %2827 }
0x1dd5   : > { %v2829_v28 = vmul.f32 0.03125, %v2828_v26 }
0x1dd7   : > { %v2830_v29 = vsub.f32 %v2823_v22, %v2829_v28 }
0x1dd9   : > { %v2831_v30 = vmul.f32 %v2830_v29, %v2830_v29  ;;  %v2851_v40 = vmul.f32 %v3041_v39, %v2830_v29 }
0x1ddb   : > { %v2832_v31 = vsel %vm494_vm0, %v2831_v30, 0.0 }
0x1ddc   : > { %2833 = vadd.xlane.f32.xlu1 %v2832_v31 }
0x1e65   : > { %v2834_v32 = vpop.xlane.xlu1 %2833 }
0x1e66   : > { %v2835_v33 = vmul.f32 0.032258064, %v2834_v32 }
0x1e68   : > { %3417 = vrsqrt.f32 %v2835_v33  ;;  %vm2838_vm13 = vcmp.eq.f32.partialorder %v2835_v33, inf  ;;  %v2841_v35 = vand.u32 2147483648, %v2835_v33  ;;  %vm2840_vm14 = vcmp.eq.f32.partialorder %v2835_v33, 0.0 }
0x1e75   : > { %v3418_v34 = vpop.eup %3417 }
0x1e76   : > { %v2837_v7 = vmul.f32 %v3418_v34, %v2835_v33 }
0x1e78   : > { %v2839_v36 = vsel %vm2838_vm13, %v2835_v33, %v2837_v7 }
0x1e79   : > { %v2842_v37 = vsel %vm2840_vm14, %v2841_v35, %v2839_v36 }
0x1e7a   : > { %v2843_v38 = vadd.f32 1e-06, %v2842_v37 }
0x1e7c   : > { %3419 = vrcp.f32 %v2843_v38 }
0x1e89   : > { %v3420_v41 = vpop.eup %3419 }
0x1e8a   : > { %v2852_v44 = vmul.f32 %v3420_v41, %v2851_v40 }
0x1e8c   : > { %v2859_v45 = vadd.f32 %v3042_v42, %v2852_v44 }
0x1e8e   : > { %2860 = vst.msk [vmem:[%s485_s23] sm:$0xff] %vm494_vm0, %v2859_v45 }
0x1e8f   : > { %3434 = shalt.err (!%p3431_p3)
}
0x1e90   : > { %s3435_s2 = scalar_lea.hbm %s2873_s4, 128  ;;  %s3439_s26 = scalar_lea.hbm %s4041_s15, 256 }
0x1e91   : > { %p3436_p4 = scmp.ne.s32.totalorder %s2873_s4, %s3435_s2  ;;  %p3440_p9 = scmp.lt.s32.totalorder %s2873_s4, %s4041_s15 }
0x1e92   : > { %p3441_p10 = scmp.lt.s32.totalorder %s3439_s26, %s3435_s2 }
0x1e93   : > { %p3437_p7 = pnand %p3436_p4, %p3615_p5 }
0x1e94   : > { %p3442_p11 = por %p3441_p10, %p3440_p9 }
0x1e95   : > { %p3438_p8 = pneg %p3437_p7 }
0x1e97   : > { %p3443_p12 = pnand %p3442_p11, %p3438_p8 }
0x1e99   : > { %3446 = shalt.err (!%p3443_p12)
}
0x1e9a   : > { %3301 = dma.vmem_to_hbm [thread:$0]  (%p3615_p5), %s2876_s1, 128, %s2873_s4, %s2862_s0  }
0x1e9b PF: > { %p3307_p13 = scmp.ge.s32.totalorder %s3481_s21, 2  ;;  %s2887_s27 = sand.u32 1, %s3469_s18  }
0x1e9c   : > { %s2888_s16 = scalar_lea.sflag [#allocation3], %s2887_s27 }
0x1e9d   : > { %p3304_p0 = pnand %p3307_p13, %p3619_p6 }
0x1e9f   : > { %p3305_p1 = pneg %p3304_p0 }
0x1ea1   : > { %3464 = dma.done.wait (%p3305_p1), %s2888_s16, 128  }
0x1ea2   : > { %3466 = vsyncadd (%p3305_p1), %s2888_s16, 4294967168  ;;  %s4077_s30 = sld [smem:[#allocation5_spill]]  ;;  %p25_p2 = scmp.ge.s32.totalorder %s3602_s24, 4  }
0x1ea3   : > { %s4078_s18 = smov %s3473_s19  ;;  %s4079_s19 = smov %s3477_s20 }
0x1ea4   : > { %s4081_s21 = smov %s3602_s24  ;;  %27 = sbr.rel (!%p25_p2) target bundleno = 9 (0x9), region = 133 }
0x1ea8   : > { %s4080_s20 = smov %s4077_s30 }
0x1ea9   :  { %2893 = vsyncpa [#allocation3], 1 }
0x1eaa   :  { %2895 = vsyncpa [#allocation3 + $0x1], 1 }

</bundles_post_ra>
